<compile_context>
chip_gen: v6e
topology: v6e:2x2x1
jax: 0.10.0
libtpu: 0.0.40
codegen_flags: <defaults>
</compile_context>

<pallas_src>
import functools

import jax
import jax.numpy as jnp
from jax.experimental import pallas as pl
from jax.experimental.pallas import tpu as pltpu


def ksom_kernel(n_valid, x_ref, w_ref, dist_ref, idx_ref, best_d, best_i):
    """Process one streamed weight tile; carry running (min, argmin) in scratch.

    x_ref   : (b_pad, D)      query batch (stream dtype), resident in VMEM
    w_ref   : (tile_n, D)     weight tile, natural (N, D) layout, streamed
    dist_ref: (1, 1, b_pad)   per-split best proxy distance (written once)
    idx_ref : (1, 1, b_pad)   per-split best neuron index   (written once)
    best_d  : (1, b_pad) f32  running best proxy distance   (VMEM scratch)
    best_i  : (1, b_pad) i32  running best neuron index     (VMEM scratch)
    """
    s = pl.program_id(0)
    j = pl.program_id(1)
    tile_n = w_ref.shape[0]

    @pl.when(j == 0)
    def _init():
        best_d[...] = jnp.full(best_d.shape, jnp.inf, best_d.dtype)
        best_i[...] = jnp.zeros(best_i.shape, best_i.dtype)

    w = w_ref[...]                                    # (tile_n, D)
    x = x_ref[...]                                    # (b_pad, D)

    # ||w||^2 from the resident tile (VPU mul + lane reduce), f32.
    w32 = w.astype(jnp.float32)
    wsq = jnp.sum(w32 * w32, axis=1, keepdims=True)   # (tile_n, 1)

    # Proxy distance ||w||^2 - 2 w.x  (== ||x-w||^2 - ||x||^2): MXU contraction
    # over the un-padded feature dim D, f32 accumulation.
    dots = jax.lax.dot_general(w, x, (((1,), (1,)), ((), ())),
                               preferred_element_type=jnp.float32)
    scores = wsq - 2.0 * dots                         # (tile_n, b_pad) f32

    # Mask padded neurons (global row index >= n_valid) so they can never win.
    base = (s * pl.num_programs(1) + j) * tile_n
    row_idx = jax.lax.broadcasted_iota(jnp.int32, (tile_n, 1), 0) + base
    scores = jnp.where(row_idx < n_valid, scores, jnp.inf)

    # Tile minimum over the neuron (sublane) axis -> lane-dense (1, b_pad).
    tile_min = jnp.min(scores, axis=0, keepdims=True)

    # First (lowest-index) neuron achieving the tile minimum per batch column.
    # Narrow (tile_n, 1) iota broadcast inside the select; f32 min (indices are
    # exact below 2^24) keeps the reduction on the same path as tile_min.
    cand = jnp.where(scores == tile_min,
                     row_idx.astype(jnp.float32), jnp.float32(3e38))
    tile_arg = jnp.min(cand, axis=0, keepdims=True).astype(jnp.int32)

    better = tile_min < best_d[...]        # strict <: earlier tiles keep ties
    best_d[...] = jnp.where(better, tile_min, best_d[...])
    best_i[...] = jnp.where(better, tile_arg, best_i[...])

    @pl.when(j == pl.num_programs(1) - 1)
    def _finalize():                        # single lane-dense store per split
        dist_ref[0] = best_d[...]
        idx_ref[0] = best_i[...]


def prepare_weights(weights, *, tile_n=512, n_splits=1,
                    stream_dtype=jnp.bfloat16):
    """Cast + row-pad the SOM weights ONCE (hoist out of the per-query path).

    Natural (N, D) layout: no transpose, no feature-dim padding.  Returns
    (w_padded, meta); cache and pass as `prepared=` to ksom_winners when the
    weights are static between queries so no per-call HBM copy is made.
    """
    N, D = weights.shape
    tile_n = max(8, (int(tile_n) // 8) * 8)           # sublane-aligned
    # Keep the double-buffered weight stream comfortably inside scoped VMEM on
    # every generation (v5e default scoped limit is only 16 MiB; v7x is 64 MiB
    # physical / 32 MiB default-scoped).
    itemsize = jnp.dtype(stream_dtype).itemsize
    budget = 6 * 1024 * 1024                          # bytes per weight buffer
    tile_n = min(tile_n, max(8, (budget // (D * itemsize)) // 8 * 8))
    tiles_total = pl.cdiv(N, tile_n)
    n_splits = max(1, min(int(n_splits), tiles_total))
    tiles_per_split = pl.cdiv(tiles_total, n_splits)
    n_pad = n_splits * tiles_per_split * tile_n
    w = weights.astype(stream_dtype)
    if n_pad != N:
        w = jnp.pad(w, ((0, n_pad - N), (0, 0)))      # zero rows, masked in-kernel
    meta = dict(n=N, d=D, tile_n=tile_n, n_splits=n_splits,
                tiles_per_split=tiles_per_split, dtype=stream_dtype)
    return w, meta


def ksom_winners(x, weights=None, *, prepared=None, tile_n=512, n_splits=1,
                 stream_dtype=jnp.bfloat16, weight_buffers=None,
                 vmem_limit_bytes=None):
    """Batched SOM winner selection (torch: argmin_n sum_d (x - w[n])**2).

    x        : (B, D) or (D,) queries
    weights  : (N, D) neurons (ignored if `prepared` is given)
    prepared : output of prepare_weights() (cache it when weights are static)
    returns  : (B,) int32 winner indices (scalar int32 for 1-D x)
    """
    if prepared is None:
        prepared = prepare_weights(weights, tile_n=tile_n, n_splits=n_splits,
                                   stream_dtype=stream_dtype)
    w_pad, meta = prepared
    N, D = meta["n"], meta["d"]
    tile_n = meta["tile_n"]
    n_splits = meta["n_splits"]
    tiles_per_split = meta["tiles_per_split"]
    stream_dtype = meta["dtype"]

    squeeze = (x.ndim == 1)
    if squeeze:
        x = x[None, :]
    B, Dx = x.shape
    assert Dx == D, (x.shape, (N, D))

    b_pad = pl.cdiv(B, 128) * 128                     # batch lands on lanes
    x_p = jnp.pad(x.astype(stream_dtype), ((0, b_pad - B), (0, 0)))

    # Scoped-VMEM hint: only raised when the streamed tiles / score temporaries
    # are large (v5e's default scoped limit is 16 MiB).
    itemsize = jnp.dtype(stream_dtype).itemsize
    est = (2 * tile_n * D * itemsize + 2 * b_pad * D * itemsize
           + 4 * tile_n * b_pad * 4 + 64 * b_pad)
    vmem_limit = vmem_limit_bytes
    if vmem_limit is None and est > 12 * 1024 * 1024:
        try:
            phys = int(pltpu.get_tpu_info().vmem_capacity_bytes)
        except Exception:
            phys = 64 * 1024 * 1024
        vmem_limit = int(min(2 * est, 0.9 * phys))

    w_spec_kwargs = {}
    if weight_buffers is not None and int(weight_buffers) > 2:
        # e.g. 3 on v7x if the trace still shows exposed DMA after larger tiles.
        w_spec_kwargs["pipeline_mode"] = pl.Buffered(int(weight_buffers))
    w_spec = pl.BlockSpec((tile_n, D),
                          lambda s, j: (s * tiles_per_split + j, 0),
                          **w_spec_kwargs)

    grid = (n_splits, tiles_per_split)                # reduction axis last
    part_dist, part_idx = pl.pallas_call(
        functools.partial(ksom_kernel, N),
        grid=grid,
        in_specs=[
            pl.BlockSpec((b_pad, D), lambda s, j: (0, 0)),   # queries: resident
            w_spec,                                          # weights: streamed
        ],
        out_specs=[
            pl.BlockSpec((1, 1, b_pad), lambda s, j: (s, 0, 0)),
            pl.BlockSpec((1, 1, b_pad), lambda s, j: (s, 0, 0)),
        ],
        out_shape=[
            jax.ShapeDtypeStruct((n_splits, 1, b_pad), jnp.float32),
            jax.ShapeDtypeStruct((n_splits, 1, b_pad), jnp.int32),
        ],
        scratch_shapes=[
            pltpu.VMEM((1, b_pad), jnp.float32),
            pltpu.VMEM((1, b_pad), jnp.int32),
        ],
        compiler_params=pltpu.CompilerParams(
            # NOTE: on v7x set the split axis to pltpu.CORE_PARALLEL (with
            # n_splits == number of TensorCores) to shard weight streaming
            # across both cores; "parallel" is kept as the portable default.
            dimension_semantics=("parallel", "arbitrary"),
            vmem_limit_bytes=vmem_limit),
    )(x_p, w_pad)

    pd = part_dist[:, 0, :B]                          # (n_splits, B)
    pi = part_idx[:, 0, :B]
    if n_splits == 1:
        winners = pi[0]
    else:
        # Lower split index covers lower neuron indices and argmin picks the
        # first minimum -> torch.argmin first-index tie-break preserved.
        best_split = jnp.argmin(pd, axis=0)
        winners = jnp.take_along_axis(pi, best_split[None, :], axis=0)[0]
    winners = winners.astype(jnp.int32)
    return winners[0] if squeeze else winners


def minmax_scale(v):
    # sklearn MinMaxScaler analogue: per-feature scaling over the batch axis.
    lo = jnp.min(v, axis=0, keepdims=True)
    hi = jnp.max(v, axis=0, keepdims=True)
    return (v - lo) / jnp.maximum(hi - lo, 1e-12)


if __name__ == "__main__":
    key = jax.random.PRNGKey(0)
    kw, kx = jax.random.split(key)

    input_dim = 500     # SOM neurons (torch: rows of `weights`); not a tile multiple
    output_dim = 48     # feature dimension; streamed UN-padded from HBM
    batch = 32          # queries per launch (amortizes pallas_call overhead)

    weights = jax.random.normal(kw, (input_dim, output_dim), dtype=jnp.float32)
    x = minmax_scale(jax.random.normal(kx, (batch, output_dim), dtype=jnp.float32))

    ref_dist = jnp.sum((x[:, None, :] - weights[None, :, :]) ** 2, axis=-1)
    ref = jnp.argmin(ref_dist, axis=1).astype(jnp.int32)

    # ---- f32 stream: exact parity with the torch module semantics ----
    winners_f32 = jax.block_until_ready(
        ksom_winners(x, weights, stream_dtype=jnp.float32))
    assert winners_f32.shape == (batch,) and winners_f32.dtype == jnp.int32
    assert jnp.array_equal(winners_f32, ref), (winners_f32, ref)

    # ---- multi-tile + 2-way split path (accumulator & split-combine) ----
    winners_split = jax.block_until_ready(
        ksom_winners(x, weights, stream_dtype=jnp.float32,
                     tile_n=128, n_splits=2))
    assert jnp.array_equal(winners_split, ref), (winners_split, ref)

    # ---- cached/prepared weights (hoists cast+pad out of the hot path) ----
    prep = prepare_weights(weights, tile_n=256, stream_dtype=jnp.float32)
    winners_prep = jax.block_until_ready(ksom_winners(x, prepared=prep))
    assert jnp.array_equal(winners_prep, ref), (winners_prep, ref)

    # ---- single-query path (original forward() signature) ----
    w0 = jax.block_until_ready(
        ksom_winners(x[0], weights, stream_dtype=jnp.float32))
    assert int(w0) == int(ref[0]), (int(w0), int(ref[0]))

    # ---- default bf16 weight/query streaming (halves HBM weight bytes) ----
    # checked against a reference on the same quantized inputs so argmin holds.
    winners_bf16 = jax.block_until_ready(ksom_winners(x, weights))
    xq = x.astype(jnp.bfloat16).astype(jnp.float32)
    wq = weights.astype(jnp.bfloat16).astype(jnp.float32)
    ref_q = jnp.argmin(jnp.sum((xq[:, None, :] - wq[None, :, :]) ** 2, axis=-1),
                       axis=1).astype(jnp.int32)
    assert jnp.array_equal(winners_bf16, ref_q), (winners_bf16, ref_q)

    print("KERNEL_OK")
</pallas_src>

<mosaic_0001>
module attributes {stable_mosaic.version = 11 : i64} {
  func.func @ksom_kernel(%arg0: i32, %arg1: i32, %arg2: memref<128x48xf32, #tpu.memory_space<vmem>>, %arg3: memref<512x48xf32, #tpu.memory_space<vmem>>, %arg4: memref<1x1x128xf32, #tpu.memory_space<vmem>>, %arg5: memref<1x1x128xi32, #tpu.memory_space<vmem>>, %arg6: memref<1x128xf32, #tpu.memory_space<vmem>>, %arg7: memref<1x128xi32, #tpu.memory_space<vmem>>) attributes {dimension_semantics = [#tpu.dimension_semantics<parallel>, #tpu.dimension_semantics<arbitrary>], iteration_bounds = array<i64: 1, 1>, scalar_prefetch = 0 : i64, scratch_operands = 2 : i64, tpu.core_type = #tpu.core_type<tc>, window_params = [{pipeline_mode = #tpu.pipeline_mode<synchronous>, transform_indices = @transform_0, window_bounds = array<i64: 128, 48>}, {transform_indices = @transform_1, window_bounds = array<i64: 512, 48>}, {transform_indices = @transform_2, window_bounds = array<i64: 1, 1, 128>}, {transform_indices = @transform_3, window_bounds = array<i64: 1, 1, 128>}]} {
    %c0_i32 = arith.constant 0 : i32
    %0 = arith.cmpi eq, %arg1, %c0_i32 : i32
    %1 = arith.extui %0 : i1 to i32
    %c0_i32_0 = arith.constant 0 : i32
    %2 = arith.cmpi ne, %1, %c0_i32_0 : i32
    scf.if %2 {
      %cst_22 = arith.constant 0x7F800000 : f32
      %48 = vector.broadcast %cst_22 : f32 to vector<1x128xf32>
      %c0_23 = arith.constant 0 : index
      %c0_24 = arith.constant 0 : index
      %49 = vector.load %arg6[%c0_23, %c0_24] : memref<1x128xf32, #tpu.memory_space<vmem>>, vector<1x128xf32>
      tpu.vector_store %arg6[%c0_23, %c0_24], %48 {strides = array<i32>} : memref<1x128xf32, #tpu.memory_space<vmem>>, vector<1x128xf32>,
      %c0_i32_25 = arith.constant 0 : i32
      %50 = vector.broadcast %c0_i32_25 : i32 to vector<1x128xi32>
      %c0_26 = arith.constant 0 : index
      %c0_27 = arith.constant 0 : index
      %51 = vector.load %arg7[%c0_26, %c0_27] : memref<1x128xi32, #tpu.memory_space<vmem>>, vector<1x128xi32>
      tpu.vector_store %arg7[%c0_26, %c0_27], %50 {strides = array<i32>} : memref<1x128xi32, #tpu.memory_space<vmem>>, vector<1x128xi32>,
    } else {
    }
    %c0 = arith.constant 0 : index
    %c0_1 = arith.constant 0 : index
    %3 = vector.load %arg3[%c0, %c0_1] : memref<512x48xf32, #tpu.memory_space<vmem>>, vector<512x48xf32>
    %c0_2 = arith.constant 0 : index
    %c0_3 = arith.constant 0 : index
    %4 = vector.load %arg2[%c0_2, %c0_3] : memref<128x48xf32, #tpu.memory_space<vmem>>, vector<128x48xf32>
    %5 = arith.mulf %3, %3 : vector<512x48xf32>
    %cst = arith.constant dense<0.000000e+00> : vector<512xf32>
    %6 = vector.multi_reduction <add>, %5, %cst [1] : vector<512x48xf32> to vector<512xf32>
    %7 = vector.shape_cast %6 : vector<512xf32> to vector<512x1xf32>
    %cst_4 = arith.constant dense<0.000000e+00> : vector<512x128xf32>
    %8 = tpu.matmul %3, %4, %cst_4 {dimension_numbers = #tpu.dot_dimension_numbers<[1], [1], [0], [0], [0, 0, 1, 0], [], []>} : vector<512x48xf32>, vector<128x48xf32>, vector<512x128xf32> -> vector<512x128xf32>
    %cst_5 = arith.constant 2.000000e+00 : f32
    %9 = vector.broadcast %cst_5 : f32 to vector<512x128xf32>
    %10 = arith.mulf %9, %8 : vector<512x128xf32>
    %11 = vector.broadcast %7 : vector<512x1xf32> to vector<512x128xf32>
    %12 = arith.subf %11, %10 : vector<512x128xf32>
    %c1_i32 = arith.constant 1 : i32
    %13 = arith.muli %arg0, %c1_i32 : i32
    %14 = arith.addi %13, %arg1 : i32
    %c512_i32 = arith.constant 512 : i32
    %15 = arith.muli %14, %c512_i32 : i32
    %16 = tpu.iota {dimensions = array<i32: 0>} : vector<512x1xi32>
    %17 = vector.broadcast %15 : i32 to vector<512x1xi32>
    %18 = arith.addi %16, %17 : vector<512x1xi32>
    %c500_i32 = arith.constant 500 : i32
    %19 = vector.broadcast %c500_i32 : i32 to vector<512x1xi32>
    %20 = arith.cmpi slt, %18, %19 : vector<512x1xi32>
    %cst_6 = arith.constant 0x7F800000 : f32
    %21 = vector.shape_cast %20 : vector<512x1xi1> to vector<512x1xi1>
    %22 = vector.broadcast %21 : vector<512x1xi1> to vector<512x128xi1>
    %23 = vector.broadcast %cst_6 : f32 to vector<512x128xf32>
    %24 = arith.select %22, %12, %23 : vector<512x128xi1>, vector<512x128xf32>
    %cst_7 = arith.constant dense<0x7F800000> : vector<128xf32>
    %25 = vector.multi_reduction <minimumf>, %24, %cst_7 [0] : vector<512x128xf32> to vector<128xf32>
    %26 = vector.shape_cast %25 : vector<128xf32> to vector<1x128xf32>
    %27 = vector.broadcast %26 : vector<1x128xf32> to vector<512x128xf32>
    %28 = arith.cmpf oeq, %24, %27 : vector<512x128xf32>
    %29 = arith.sitofp %18 : vector<512x1xi32> to vector<512x1xf32>
    %cst_8 = arith.constant 3.000000e+38 : f32
    %30 = vector.shape_cast %29 : vector<512x1xf32> to vector<512x1xf32>
    %31 = vector.broadcast %30 : vector<512x1xf32> to vector<512x128xf32>
    %32 = vector.broadcast %cst_8 : f32 to vector<512x128xf32>
    %33 = arith.select %28, %31, %32 : vector<512x128xi1>, vector<512x128xf32>
    %cst_9 = arith.constant dense<0x7F800000> : vector<128xf32>
    %34 = vector.multi_reduction <minimumf>, %33, %cst_9 [0] : vector<512x128xf32> to vector<128xf32>
    %35 = vector.shape_cast %34 : vector<128xf32> to vector<1x128xf32>
    %36 = arith.fptosi %35 : vector<1x128xf32> to vector<1x128xi32>
    %c0_10 = arith.constant 0 : index
    %c0_11 = arith.constant 0 : index
    %37 = vector.load %arg6[%c0_10, %c0_11] : memref<1x128xf32, #tpu.memory_space<vmem>>, vector<1x128xf32>
    %38 = arith.cmpf olt, %26, %37 : vector<1x128xf32>
    %c0_12 = arith.constant 0 : index
    %c0_13 = arith.constant 0 : index
    %39 = vector.load %arg6[%c0_12, %c0_13] : memref<1x128xf32, #tpu.memory_space<vmem>>, vector<1x128xf32>
    %40 = arith.select %38, %26, %39 : vector<1x128xi1>, vector<1x128xf32>
    %c0_14 = arith.constant 0 : index
    %c0_15 = arith.constant 0 : index
    %41 = vector.load %arg6[%c0_14, %c0_15] : memref<1x128xf32, #tpu.memory_space<vmem>>, vector<1x128xf32>
    tpu.vector_store %arg6[%c0_14, %c0_15], %40 {strides = array<i32>} : memref<1x128xf32, #tpu.memory_space<vmem>>, vector<1x128xf32>,
    %c0_16 = arith.constant 0 : index
    %c0_17 = arith.constant 0 : index
    %42 = vector.load %arg7[%c0_16, %c0_17] : memref<1x128xi32, #tpu.memory_space<vmem>>, vector<1x128xi32>
    %43 = arith.select %38, %36, %42 : vector<1x128xi1>, vector<1x128xi32>
    %c0_18 = arith.constant 0 : index
    %c0_19 = arith.constant 0 : index
    %44 = vector.load %arg7[%c0_18, %c0_19] : memref<1x128xi32, #tpu.memory_space<vmem>>, vector<1x128xi32>
    tpu.vector_store %arg7[%c0_18, %c0_19], %43 {strides = array<i32>} : memref<1x128xi32, #tpu.memory_space<vmem>>, vector<1x128xi32>,
    %c0_i32_20 = arith.constant 0 : i32
    %45 = arith.cmpi eq, %arg1, %c0_i32_20 : i32
    %46 = arith.extui %45 : i1 to i32
    %c0_i32_21 = arith.constant 0 : i32
    %47 = arith.cmpi ne, %46, %c0_i32_21 : i32
    scf.if %47 {
      %c0_22 = arith.constant 0 : index
      %c0_23 = arith.constant 0 : index
      %48 = vector.load %arg6[%c0_22, %c0_23] : memref<1x128xf32, #tpu.memory_space<vmem>>, vector<1x128xf32>
      %c0_24 = arith.constant 0 : index
      %c0_25 = arith.constant 0 : index
      %c0_26 = arith.constant 0 : index
      %49 = vector.load %arg4[%c0_24, %c0_25, %c0_26] : memref<1x1x128xf32, #tpu.memory_space<vmem>>, vector<1x1x128xf32>
      %50 = vector.shape_cast %49 : vector<1x1x128xf32> to vector<1x128xf32>
      %51 = vector.shape_cast %48 : vector<1x128xf32> to vector<1x1x128xf32>
      tpu.vector_store %arg4[%c0_24, %c0_25, %c0_26], %51 {strides = array<i32>} : memref<1x1x128xf32, #tpu.memory_space<vmem>>, vector<1x1x128xf32>,
      %c0_27 = arith.constant 0 : index
      %c0_28 = arith.constant 0 : index
      %52 = vector.load %arg7[%c0_27, %c0_28] : memref<1x128xi32, #tpu.memory_space<vmem>>, vector<1x128xi32>
      %c0_29 = arith.constant 0 : index
      %c0_30 = arith.constant 0 : index
      %c0_31 = arith.constant 0 : index
      %53 = vector.load %arg5[%c0_29, %c0_30, %c0_31] : memref<1x1x128xi32, #tpu.memory_space<vmem>>, vector<1x1x128xi32>
      %54 = vector.shape_cast %53 : vector<1x1x128xi32> to vector<1x128xi32>
      %55 = vector.shape_cast %52 : vector<1x128xi32> to vector<1x1x128xi32>
      tpu.vector_store %arg5[%c0_29, %c0_30, %c0_31], %55 {strides = array<i32>} : memref<1x1x128xi32, #tpu.memory_space<vmem>>, vector<1x1x128xi32>,
    } else {
    }
    return
  }
  func.func @transform_0(%arg0: i32, %arg1: i32) -> (i32, i32) {
    %c0_i32 = arith.constant 0 : i32
    %c0_i32_0 = arith.constant 0 : i32
    %c0_i32_1 = arith.constant 0 : i32
    return %c0_i32, %c0_i32_0 : i32, i32
  }
  func.func @transform_1(%arg0: i32, %arg1: i32) -> (i32, i32) {
    %c1_i32 = arith.constant 1 : i32
    %0 = arith.muli %arg0, %c1_i32 : i32
    %1 = arith.addi %0, %arg1 : i32
    %c0_i32 = arith.constant 0 : i32
    %c0_i32_0 = arith.constant 0 : i32
    return %1, %c0_i32 : i32, i32
  }
  func.func @transform_2(%arg0: i32, %arg1: i32) -> (i32, i32, i32) {
    %c0_i32 = arith.constant 0 : i32
    %c0_i32_0 = arith.constant 0 : i32
    %c0_i32_1 = arith.constant 0 : i32
    return %arg0, %c0_i32, %c0_i32_0 : i32, i32, i32
  }
  func.func @transform_3(%arg0: i32, %arg1: i32) -> (i32, i32, i32) {
    %c0_i32 = arith.constant 0 : i32
    %c0_i32_0 = arith.constant 0 : i32
    %c0_i32_1 = arith.constant 0 : i32
    return %arg0, %c0_i32, %c0_i32_0 : i32, i32, i32
  }
}

</mosaic_0001>

<bundles_post_ra>
// kernel: tpu_custom_call.1
= control target key start
LH: loop header
LB: loop body
LE: loop exit
PB: predicated region body
PF: predicated region fallthrough
CT: control target
= control target key end

     0   :  { %9 = vsyncpa [#allocation5], 0  ;;  %vm187_vm0 = vcmask 392192   ;;  %s3955_s0 = inlined_call_operand.vmem [shape: f32[128,48], index: 0, kind: input, shape index: {}]   ;;  %s3956_s1 = inlined_call_operand.vmem [shape: f32[512,48], index: 1, kind: input, shape index: {}]   ;;  %s3957_s2 = inlined_call_operand.hbm [shape: f32[1,1,128], index: 2, kind: output, shape index: {0}]   ;;  %s3958_s3 = inlined_call_operand.hbm [shape: s32[1,1,128], index: 3, kind: output, shape index: {1}]  }
   0x1   :  { %v122_v0 = vld [vmem:[%s3955_s0 + $0x78] sm:$0xff]  ;;  %v121_v1 = vld [vmem:[%s3955_s0 + $0x70] sm:$0xff]  ;;  %v120_v2 = vld [vmem:[%s3955_s0 + $0x68] sm:$0xff] }
   0x2   :  { %2061 = vmatprep.subr.msk.mxu0 %vm187_vm0, %v122_v0  ;;  %2189 = vmatprep.subr.msk.mxu1 %vm187_vm0, %v122_v0  ;;  %v43_v3 = vld [vmem:[%s3956_s1] sm:$0xff]  ;;  %v2316_v4 = vld [vmem:[%s3956_s1 + $0x8] sm:$0xff]  ;;  %v2323_v6 = vld [vmem:[%s3956_s1 + $0x10] sm:$0xff] }
   0x3   :  { %2062 = vmatpush3.xpose.msk.msra.mxu0 %vm187_vm0, %v122_v0  ;;  %2205 = vmatpush3.xpose.msk.msra.mxu1 %vm187_vm0, %v122_v0  ;;  %v123_v5 = vmul.f32 %v43_v3, %v43_v3  ;;  %v2328_v7 = vld [vmem:[%s3956_s1 + $0x20] sm:$0xff]  ;;  %v124_v8 = vmul.f32 %v2316_v4, %v2316_v4  ;;  %v125_v9 = vmul.f32 %v2323_v6, %v2323_v6  ;;  %v2352_v14 = vld [vmem:[%s3956_s1 + $0x28] sm:$0xff]  ;;  %v2362_v17 = vld [vmem:[%s3956_s1 + $0x30] sm:$0xff] }
   0x4   :  { %2063 = vmatprep.subr.msk.mxu0 %vm187_vm0, %v121_v1  ;;  %2190 = vmatprep.subr.msk.mxu1 %vm187_vm0, %v121_v1  ;;  %v2339_v10 = vld [vmem:[%s3956_s1 + $0x100] sm:$0xff]  ;;  %v127_v15 = vmul.f32 %v2328_v7, %v2328_v7  ;;  %v128_v18 = vmul.f32 %v2352_v14, %v2352_v14  ;;  %v118_v19 = vld [vmem:[%s3955_s0 + $0x58] sm:$0xff]  ;;  %v129_v22 = vmul.f32 %v2362_v17, %v2362_v17  ;;  %v117_v25 = vld [vmem:[%s3955_s0 + $0x50] sm:$0xff] }
   0x5   :  { %v119_v11 = vld [vmem:[%s3955_s0 + $0x60] sm:$0xff]  ;;  %2093 = vmatprep.mubr.msk.f32.mxu0 %vm187_vm0, %v43_v3  ;;  %v188_v12 = vsel %vm187_vm0, %v123_v5, 0.0  ;;  %2141 = vmatprep.mubr.msk.f32.mxu1 %vm187_vm0, %v2339_v10  ;;  %v194_v13 = vsel %vm187_vm0, %v125_v9, 0.0  ;;  %v191_v16 = vsel %vm187_vm0, %v124_v8, 0.0  ;;  %v2374_v20 = vld [vmem:[%s3956_s1 + $0x18] sm:$0xff]  ;;  %v116_v32 = vld [vmem:[%s3955_s0 + $0x48] sm:$0xff] }
   0x6   :  { %189 = vadd.xlane.f32.xlu0 %v188_v12  ;;  %195 = vadd.xlane.f32.xlu1 %v194_v13  ;;  %v200_v21 = vsel %vm187_vm0, %v127_v15, 0.0  ;;  %v203_v23 = vsel %vm187_vm0, %v128_v18, 0.0  ;;  %v126_v24 = vmul.f32 %v2374_v20, %v2374_v20  ;;  %v2392_v26 = vld [vmem:[%s3956_s1 + $0x38] sm:$0xff]  ;;  %v2397_v27 = vld [vmem:[%s3956_s1 + $0x40] sm:$0xff]  ;;  %v206_v28 = vsel %vm187_vm0, %v129_v22, 0.0  ;;  %v2415_v33 = vld [vmem:[%s3956_s1 + $0x48] sm:$0xff] }
   0x7   :  { %2064 = vmatpush3.xpose.msk.msra.mxu0 %vm187_vm0, %v121_v1  ;;  %2206 = vmatpush3.xpose.msk.msra.mxu1 %vm187_vm0, %v121_v1  ;;  %v130_v29 = vmul.f32 %v2392_v26, %v2392_v26  ;;  %v131_v31 = vmul.f32 %v2397_v27, %v2397_v27  ;;  %v2420_v34 = vld [vmem:[%s3956_s1 + $0x50] sm:$0xff]  ;;  %v132_v36 = vmul.f32 %v2415_v33, %v2415_v33  ;;  %v115_v39 = vld [vmem:[%s3955_s0 + $0x40] sm:$0xff]  ;;  %v2438_v40 = vld [vmem:[%s3956_s1 + $0x58] sm:$0xff] }
   0x8   :  { %2065 = vmatprep.subr.msk.mxu0 %vm187_vm0, %v120_v2  ;;  %2191 = vmatprep.subr.msk.mxu1 %vm187_vm0, %v120_v2  ;;  %v197_v30 = vsel %vm187_vm0, %v126_v24, 0.0  ;;  %v133_v38 = vmul.f32 %v2420_v34, %v2420_v34  ;;  %v2443_v41 = vld [vmem:[%s3956_s1 + $0x60] sm:$0xff]  ;;  %v134_v43 = vmul.f32 %v2438_v40, %v2438_v40 }
   0x9   :  { %v209_v35 = vsel %vm187_vm0, %v130_v29, 0.0  ;;  %v212_v37 = vsel %vm187_vm0, %v131_v31, 0.0  ;;  %v215_v42 = vsel %vm187_vm0, %v132_v36, 0.0  ;;  %v135_v45 = vmul.f32 %v2443_v41, %v2443_v41 }
   0xa   :  { %192 = vadd.xlane.f32.xlu0 %v191_v16  ;;  %201 = vadd.xlane.f32.xlu1 %v200_v21  ;;  %v218_v44 = vsel %vm187_vm0, %v133_v38, 0.0 }
   0xb   :  { %2066 = vmatpush3.xpose.msk.msra.mxu0 %vm187_vm0, %v120_v2  ;;  %2207 = vmatpush3.xpose.msk.msra.mxu1 %vm187_vm0, %v120_v2 }
   0xc   :  { %2067 = vmatprep.subr.msk.mxu0 %vm187_vm0, %v119_v11  ;;  %2192 = vmatprep.subr.msk.mxu1 %vm187_vm0, %v119_v11 }
   0xe   :  { %204 = vadd.xlane.f32.xlu0 %v203_v23  ;;  %207 = vadd.xlane.f32.xlu1 %v206_v28 }
   0xf   :  { %2068 = vmatpush3.xpose.msk.msra.mxu0 %vm187_vm0, %v119_v11  ;;  %2208 = vmatpush3.xpose.msk.msra.mxu1 %vm187_vm0, %v119_v11 }
  0x10   :  { %2069 = vmatprep.subr.msk.mxu0 %vm187_vm0, %v118_v19  ;;  %2193 = vmatprep.subr.msk.mxu1 %vm187_vm0, %v118_v19 }
  0x12   :  { %198 = vadd.xlane.f32.xlu0 %v197_v30  ;;  %210 = vadd.xlane.f32.xlu1 %v209_v35 }
  0x13   :  { %2070 = vmatpush3.xpose.msk.msra.mxu0 %vm187_vm0, %v118_v19  ;;  %2209 = vmatpush3.xpose.msk.msra.mxu1 %vm187_vm0, %v118_v19 }
  0x14   :  { %2071 = vmatprep.subr.msk.mxu0 %vm187_vm0, %v117_v25  ;;  %2194 = vmatprep.subr.msk.mxu1 %vm187_vm0, %v117_v25 }
  0x16   :  { %213 = vadd.xlane.f32.xlu0 %v212_v37 }
  0x17   :  { %2072 = vmatpush3.xpose.msk.msra.mxu0 %vm187_vm0, %v117_v25  ;;  %2210 = vmatpush3.xpose.msk.msra.mxu1 %vm187_vm0, %v117_v25 }
  0x18   :  { %2073 = vmatprep.subr.msk.mxu0 %vm187_vm0, %v116_v32  ;;  %2195 = vmatprep.subr.msk.mxu1 %vm187_vm0, %v116_v32 }
  0x1b   :  { %2074 = vmatpush3.xpose.msk.msra.mxu0 %vm187_vm0, %v116_v32  ;;  %2211 = vmatpush3.xpose.msk.msra.mxu1 %vm187_vm0, %v116_v32 }
  0x1c   :  { %10 = vsyncpa [#allocation7], 0  ;;  %2075 = vmatprep.subr.msk.mxu0 %vm187_vm0, %v115_v39  ;;  %2196 = vmatprep.subr.msk.mxu1 %vm187_vm0, %v115_v39  ;;  %v114_v46 = vld [vmem:[%s3955_s0 + $0x38] sm:$0xff]  ;;  %v2461_v47 = vld [vmem:[%s3956_s1 + $0x68] sm:$0xff]  ;;  %v221_v49 = vsel %vm187_vm0, %v134_v43, 0.0  ;;  %v224_v51 = vsel %vm187_vm0, %v135_v45, 0.0 }
  0x1d   :  { %216 = vadd.xlane.f32.xlu1 %v215_v42  ;;  %219 = vadd.xlane.f32.xlu0 %v218_v44  ;;  %v2466_v48 = vld [vmem:[%s3956_s1 + $0x70] sm:$0xff]  ;;  %v136_v50 = vmul.f32 %v2461_v47, %v2461_v47  ;;  %v2484_v54 = vld [vmem:[%s3956_s1 + $0x78] sm:$0xff]  ;;  %v2489_v55 = vld [vmem:[%s3956_s1 + $0x80] sm:$0xff] }
  0x1e   :  { %v137_v52 = vmul.f32 %v2466_v48, %v2466_v48  ;;  %v113_v53 = vld [vmem:[%s3955_s0 + $0x30] sm:$0xff]  ;;  %v138_v57 = vmul.f32 %v2484_v54, %v2484_v54  ;;  %v139_v59 = vmul.f32 %v2489_v55, %v2489_v55  ;;  %v112_v60 = vld [vmem:[%s3955_s0 + $0x28] sm:$0xff]  ;;  %v111_v3 = vld [vmem:[%s3955_s0 + $0x20] sm:$0xff] }
  0x1f   :  { %2076 = vmatpush3.xpose.msk.msra.mxu0 %vm187_vm0, %v115_v39  ;;  %2212 = vmatpush3.xpose.msk.msra.mxu1 %vm187_vm0, %v115_v39  ;;  %v227_v56 = vsel %vm187_vm0, %v136_v50, 0.0  ;;  %v2507_v61 = vld [vmem:[%s3956_s1 + $0x88] sm:$0xff]  ;;  %v2512_v62 = vld [vmem:[%s3956_s1 + $0x90] sm:$0xff]  ;;  %v2530_v5 = vld [vmem:[%s3956_s1 + $0x98] sm:$0xff] }
  0x20   :  { %2077 = vmatprep.subr.msk.mxu0 %vm187_vm0, %v114_v46  ;;  %2197 = vmatprep.subr.msk.mxu1 %vm187_vm0, %v114_v46  ;;  %v230_v58 = vsel %vm187_vm0, %v137_v52, 0.0  ;;  %v233_v63 = vsel %vm187_vm0, %v138_v57, 0.0  ;;  %v140_v0 = vmul.f32 %v2507_v61, %v2507_v61  ;;  %v236_v1 = vsel %vm187_vm0, %v139_v59, 0.0  ;;  %v2535_v8 = vld [vmem:[%s3956_s1 + $0xa0] sm:$0xff]  ;;  %v110_v15 = vld [vmem:[%s3955_s0 + $0x18] sm:$0xff]  ;;  %v2553_v16 = vld [vmem:[%s3956_s1 + $0xa8] sm:$0xff] }
  0x21   :  { %222 = vadd.xlane.f32.xlu1 %v221_v49  ;;  %225 = vadd.xlane.f32.xlu0 %v224_v51  ;;  %v141_v2 = vmul.f32 %v2512_v62, %v2512_v62  ;;  %v142_v11 = vmul.f32 %v2530_v5, %v2530_v5  ;;  %v143_v13 = vmul.f32 %v2535_v8, %v2535_v8  ;;  %v2558_v18 = vld [vmem:[%s3956_s1 + $0xb0] sm:$0xff]  ;;  %v2576_v25 = vld [vmem:[%s3956_s1 + $0xb8] sm:$0xff]  ;;  %v2581_v28 = vld [vmem:[%s3956_s1 + $0xc0] sm:$0xff] }
  0x22   :  { %v239_v9 = vsel %vm187_vm0, %v140_v0, 0.0  ;;  %v144_v21 = vmul.f32 %v2553_v16, %v2553_v16  ;;  %v145_v23 = vmul.f32 %v2558_v18, %v2558_v18  ;;  %v109_v24 = vld [vmem:[%s3955_s0 + $0x10] sm:$0xff]  ;;  %v146_v30 = vmul.f32 %v2576_v25, %v2576_v25  ;;  %v108_v35 = vld [vmem:[%s3955_s0 + $0x8] sm:$0xff]  ;;  %v107_v44 = vld [vmem:[%s3955_s0] sm:$0xff] }
  0x23   :  { %2078 = vmatpush3.xpose.msk.msra.mxu0 %vm187_vm0, %v114_v46  ;;  %2213 = vmatpush3.xpose.msk.msra.mxu1 %vm187_vm0, %v114_v46  ;;  %v242_v12 = vsel %vm187_vm0, %v141_v2, 0.0  ;;  %v245_v19 = vsel %vm187_vm0, %v142_v11, 0.0  ;;  %v248_v22 = vsel %vm187_vm0, %v143_v13, 0.0  ;;  %v147_v32 = vmul.f32 %v2581_v28, %v2581_v28  ;;  %v2599_v36 = vld [vmem:[%s3956_s1 + $0xc8] sm:$0xff]  ;;  %v2604_v37 = vld [vmem:[%s3956_s1 + $0xd0] sm:$0xff]  ;;  %v2622_v45 = vld [vmem:[%s3956_s1 + $0xd8] sm:$0xff] }
  0x24   :  { %2079 = vmatprep.subr.msk.mxu0 %vm187_vm0, %v113_v53  ;;  %2198 = vmatprep.subr.msk.mxu1 %vm187_vm0, %v113_v53  ;;  %v251_v29 = vsel %vm187_vm0, %v144_v21, 0.0  ;;  %v254_v31 = vsel %vm187_vm0, %v145_v23, 0.0  ;;  %v257_v38 = vsel %vm187_vm0, %v146_v30, 0.0  ;;  %v148_v39 = vmul.f32 %v2599_v36, %v2599_v36  ;;  %v2635_v51 = vld [vmem:[%s3956_s1 + $0xe0] sm:$0xff]  ;;  %v2640_v52 = vld [vmem:[%s3956_s1 + $0xe8] sm:$0xff]  ;;  %v77_v59 = vld [vmem:[%s3956_s1 + $0x110] sm:$0xff] }
  0x25   :  { %228 = vadd.xlane.f32.xlu1 %v227_v56  ;;  %231 = vadd.xlane.f32.xlu0 %v230_v58  ;;  %v260_v42 = vsel %vm187_vm0, %v147_v32, 0.0  ;;  %v149_v43 = vmul.f32 %v2604_v37, %v2604_v37  ;;  %v150_v49 = vmul.f32 %v2622_v45, %v2622_v45  ;;  %v152_v57 = vmul.f32 %v2640_v52, %v2640_v52  ;;  %v76_v58 = vld [vmem:[%s3956_s1 + $0x108] sm:$0xff]  ;;  %v83_v23 = vld [vmem:[%s3956_s1 + $0x140] sm:$0xff] }
  0x26   :  { %v263_v46 = vsel %vm187_vm0, %v148_v39, 0.0  ;;  %v155_v11 = vmul.f32 %v2339_v10, %v2339_v10  ;;  %v156_v13 = vmul.f32 %v76_v58, %v76_v58  ;;  %v80_v10 = vld [vmem:[%s3956_s1 + $0x128] sm:$0xff]  ;;  %v87_v39 = vld [vmem:[%s3956_s1 + $0x160] sm:$0xff] }
  0x27   :  { %2080 = vmatpush3.xpose.msk.msra.mxu0 %vm187_vm0, %v113_v53  ;;  %2214 = vmatpush3.xpose.msk.msra.mxu1 %vm187_vm0, %v113_v53  ;;  %v266_v50 = vsel %vm187_vm0, %v149_v43, 0.0  ;;  %v151_v53 = vmul.f32 %v2635_v51, %v2635_v51  ;;  %v269_v56 = vsel %vm187_vm0, %v150_v49, 0.0  ;;  %v275_v2 = vsel %vm187_vm0, %v152_v57, 0.0  ;;  %v84_v30 = vld [vmem:[%s3956_s1 + $0x148] sm:$0xff] }
  0x28   :  { %2081 = vmatprep.subr.msk.mxu0 %vm187_vm0, %v112_v60  ;;  %2199 = vmatprep.subr.msk.mxu1 %vm187_vm0, %v112_v60  ;;  %v164_v43 = vmul.f32 %v84_v30, %v84_v30  ;;  %v167_v57 = vmul.f32 %v87_v39, %v87_v39 }
  0x29   :  { %234 = vadd.xlane.f32.xlu1 %v233_v63  ;;  %237 = vadd.xlane.f32.xlu0 %v236_v1  ;;  %v2663_v63 = vld [vmem:[%s3956_s1 + $0xf8] sm:$0xff]  ;;  %v272_v0 = vsel %vm187_vm0, %v151_v53, 0.0 }
  0x2a   :  { %v90_v53 = vld [vmem:[%s3956_s1 + $0x178] sm:$0xff] }
  0x2b   :  { %2082 = vmatpush3.xpose.msk.msra.mxu0 %vm187_vm0, %v112_v60  ;;  %2215 = vmatpush3.xpose.msk.msra.mxu1 %vm187_vm0, %v112_v60  ;;  %v2658_v60 = vld [vmem:[%s3956_s1 + $0xf0] sm:$0xff] }
  0x2c   :  { %2083 = vmatprep.subr.msk.mxu0 %vm187_vm0, %v111_v3  ;;  %2200 = vmatprep.subr.msk.mxu1 %vm187_vm0, %v111_v3  ;;  %v153_v1 = vmul.f32 %v2658_v60, %v2658_v60 }
  0x2d   :  { %240 = vadd.xlane.f32.xlu1 %v239_v9  ;;  %243 = vadd.xlane.f32.xlu0 %v242_v12  ;;  %v78_v9 = vld [vmem:[%s3956_s1 + $0x118] sm:$0xff] }
  0x2e   :  { %v278_v12 = vsel %vm187_vm0, %v153_v1, 0.0  ;;  %v158_v21 = vmul.f32 %v78_v9, %v78_v9 }
  0x2f   :  { %2084 = vmatpush3.xpose.msk.msra.mxu0 %vm187_vm0, %v111_v3  ;;  %2216 = vmatpush3.xpose.msk.msra.mxu1 %vm187_vm0, %v111_v3  ;;  %v154_v3 = vmul.f32 %v2663_v63, %v2663_v63 }
  0x30   :  { %2085 = vmatprep.subr.msk.mxu0 %vm187_vm0, %v110_v15  ;;  %2201 = vmatprep.subr.msk.mxu1 %vm187_vm0, %v110_v15 }
  0x31   :  { %246 = vadd.xlane.f32.xlu1 %v245_v19  ;;  %249 = vadd.xlane.f32.xlu0 %v248_v22  ;;  %v157_v19 = vmul.f32 %v77_v59, %v77_v59  ;;  %v82_v22 = vld [vmem:[%s3956_s1 + $0x138] sm:$0xff] }
  0x33   :  { %2086 = vmatpush3.xpose.msk.msra.mxu0 %vm187_vm0, %v110_v15  ;;  %2217 = vmatpush3.xpose.msk.msra.mxu1 %vm187_vm0, %v110_v15  ;;  %v81_v15 = vld [vmem:[%s3956_s1 + $0x130] sm:$0xff] }
  0x34   :  { %2087 = vmatprep.subr.msk.mxu0 %vm187_vm0, %v109_v24  ;;  %2202 = vmatprep.subr.msk.mxu1 %vm187_vm0, %v109_v24  ;;  %v161_v32 = vmul.f32 %v81_v15, %v81_v15 }
  0x35   :  { %252 = vadd.xlane.f32.xlu1 %v251_v29  ;;  %255 = vadd.xlane.f32.xlu0 %v254_v31  ;;  %v160_v29 = vmul.f32 %v80_v10, %v80_v10  ;;  %v85_v31 = vld [vmem:[%s3956_s1 + $0x150] sm:$0xff] }
  0x36   :  { %v165_v49 = vmul.f32 %v85_v31, %v85_v31 }
  0x37   :  { %2088 = vmatpush3.xpose.msk.msra.mxu0 %vm187_vm0, %v109_v24  ;;  %2218 = vmatpush3.xpose.msk.msra.mxu1 %vm187_vm0, %v109_v24 }
  0x38   :  { %2089 = vmatprep.subr.msk.mxu0 %vm187_vm0, %v108_v35  ;;  %2203 = vmatprep.subr.msk.mxu1 %vm187_vm0, %v108_v35 }
  0x39   :  { %258 = vadd.xlane.f32.xlu1 %v257_v38  ;;  %261 = vadd.xlane.f32.xlu0 %v260_v42  ;;  %v86_v38 = vld [vmem:[%s3956_s1 + $0x158] sm:$0xff]  ;;  %v163_v42 = vmul.f32 %v83_v23, %v83_v23 }
  0x3b   :  { %2090 = vmatpush3.xpose.msk.msra.mxu0 %vm187_vm0, %v108_v35  ;;  %2219 = vmatpush3.xpose.msk.msra.mxu1 %vm187_vm0, %v108_v35  ;;  %v162_v35 = vmul.f32 %v82_v22, %v82_v22 }
  0x3c   :  { %2091 = vmatprep.subr.msk.mxu0 %vm187_vm0, %v107_v44  ;;  %2204 = vmatprep.subr.msk.mxu1 %vm187_vm0, %v107_v44 }
  0x3d   :  { %264 = vadd.xlane.f32.xlu1 %v263_v46  ;;  %267 = vadd.xlane.f32.xlu0 %v266_v50  ;;  %v89_v46 = vld [vmem:[%s3956_s1 + $0x170] sm:$0xff]  ;;  %v166_v50 = vmul.f32 %v86_v38, %v86_v38 }
  0x3e   :  { %v169_v1 = vmul.f32 %v89_v46, %v89_v46 }
  0x3f   :  { %2092 = vmatpush3.xpose.msk.msra.mxu0 %vm187_vm0, %v107_v44  ;;  %2220 = vmatpush3.xpose.msk.msra.mxu1 %vm187_vm0, %v107_v44  ;;  %v88_v44 = vld [vmem:[%s3956_s1 + $0x168] sm:$0xff] }
  0x41   :  { %270 = vadd.xlane.f32.xlu1 %v269_v56  ;;  %273 = vadd.xlane.f32.xlu0 %v272_v0  ;;  %v91_v56 = vld [vmem:[%s3956_s1 + $0x180] sm:$0xff]  ;;  %v93_v0 = vld [vmem:[%s3956_s1 + $0x190] sm:$0xff] }
  0x42   :  { %2094 = vmatmul.mubr.msk.f32.vlgmr.msra.gmra.mxu0 %vm187_vm0, %v2316_v4  ;;  %2142 = vmatmul.mubr.msk.f32.vlgmr.msra.gmra.mxu1 %vm187_vm0, %v76_v58  ;;  %v79_v4 = vld [vmem:[%s3956_s1 + $0x120] sm:$0xff]  ;;  %v168_v58 = vmul.f32 %v88_v44, %v88_v44 }
  0x43   :  { %2096 = vmatprep.mubr.msk.f32.mxu0 %vm187_vm0, %v2323_v6  ;;  %2144 = vmatprep.mubr.msk.f32.mxu1 %vm187_vm0, %v77_v59  ;;  %v281_v6 = vsel %vm187_vm0, %v154_v3, 0.0  ;;  %v159_v24 = vmul.f32 %v79_v4, %v79_v4  ;;  %v92_v59 = vld [vmem:[%s3956_s1 + $0x188] sm:$0xff]  ;;  %v94_v3 = vld [vmem:[%s3956_s1 + $0x198] sm:$0xff] }
  0x45   :  { %276 = vadd.xlane.f32.xlu1 %v275_v2  ;;  %279 = vadd.xlane.f32.xlu0 %v278_v12  ;;  %v170_v2 = vmul.f32 %v90_v53, %v90_v53  ;;  %v96_v12 = vld [vmem:[%s3956_s1 + $0x1a8] sm:$0xff] }
  0x46   :  { %2097 = vmatmul.mubr.msk.f32.gmra.mxu0 %vm187_vm0, %v2374_v20  ;;  %2145 = vmatmul.mubr.msk.f32.gmra.mxu1 %vm187_vm0, %v78_v9  ;;  %v284_v20 = vsel %vm187_vm0, %v155_v11, 0.0  ;;  %v95_v9 = vld [vmem:[%s3956_s1 + $0x1a0] sm:$0xff]  ;;  %v172_v11 = vmul.f32 %v92_v59, %v92_v59 }
  0x47   :  { %2099 = vmatprep.mubr.msk.f32.mxu0 %vm187_vm0, %v2328_v7  ;;  %2147 = vmatprep.mubr.msk.f32.mxu1 %vm187_vm0, %v79_v4  ;;  %v287_v7 = vsel %vm187_vm0, %v156_v13, 0.0  ;;  %v171_v4 = vmul.f32 %v91_v56, %v91_v56  ;;  %v173_v13 = vmul.f32 %v93_v0, %v93_v0 }
  0x49   :  { %282 = vadd.xlane.f32.xlu1 %v281_v6  ;;  %285 = vadd.xlane.f32.xlu0 %v284_v20  ;;  %v97_v6 = vld [vmem:[%s3956_s1 + $0x1b0] sm:$0xff]  ;;  %v99_v20 = vld [vmem:[%s3956_s1 + $0x1c0] sm:$0xff] }
  0x4a   :  { %2100 = vmatmul.mubr.msk.f32.gmra.mxu0 %vm187_vm0, %v2352_v14  ;;  %2148 = vmatmul.mubr.msk.f32.gmra.mxu1 %vm187_vm0, %v80_v10  ;;  %v290_v14 = vsel %vm187_vm0, %v157_v19, 0.0  ;;  %v174_v10 = vmul.f32 %v94_v3, %v94_v3  ;;  %v175_v19 = vmul.f32 %v95_v9, %v95_v9 }
  0x4b   :  { %2102 = vmatprep.mubr.msk.f32.mxu0 %vm187_vm0, %v2362_v17  ;;  %2150 = vmatprep.mubr.msk.f32.mxu1 %vm187_vm0, %v81_v15  ;;  %v293_v17 = vsel %vm187_vm0, %v158_v21, 0.0  ;;  %v98_v15 = vld [vmem:[%s3956_s1 + $0x1b8] sm:$0xff]  ;;  %v100_v21 = vld [vmem:[%s3956_s1 + $0x1c8] sm:$0xff] }
  0x4d   :  { %288 = vadd.xlane.f32.xlu1 %v287_v7  ;;  %291 = vadd.xlane.f32.xlu0 %v290_v14  ;;  %v176_v7 = vmul.f32 %v96_v12, %v96_v12  ;;  %v178_v14 = vmul.f32 %v98_v15, %v98_v15 }
  0x4e   :  { %2103 = vmatmul.mubr.msk.f32.gmra.mxu0 %vm187_vm0, %v2392_v26  ;;  %2151 = vmatmul.mubr.msk.f32.gmra.mxu1 %vm187_vm0, %v82_v22  ;;  %v296_v26 = vsel %vm187_vm0, %v159_v24, 0.0  ;;  %v101_v22 = vld [vmem:[%s3956_s1 + $0x1d0] sm:$0xff]  ;;  %v102_v24 = vld [vmem:[%s3956_s1 + $0x1d8] sm:$0xff] }
  0x4f   :  { %2105 = vmatprep.mubr.msk.f32.mxu0 %vm187_vm0, %v2397_v27  ;;  %2153 = vmatprep.mubr.msk.f32.mxu1 %vm187_vm0, %v83_v23  ;;  %v299_v27 = vsel %vm187_vm0, %v160_v29, 0.0  ;;  %v177_v23 = vmul.f32 %v97_v6, %v97_v6  ;;  %v179_v29 = vmul.f32 %v99_v20, %v99_v20 }
  0x51   :  { %294 = vadd.xlane.f32.xlu1 %v293_v17  ;;  %297 = vadd.xlane.f32.xlu0 %v296_v26  ;;  %v103_v17 = vld [vmem:[%s3956_s1 + $0x1e0] sm:$0xff]  ;;  %v105_v26 = vld [vmem:[%s3956_s1 + $0x1f0] sm:$0xff] }
  0x52   :  { %2106 = vmatmul.mubr.msk.f32.gmra.mxu0 %vm187_vm0, %v2415_v33  ;;  %2154 = vmatmul.mubr.msk.f32.gmra.mxu1 %vm187_vm0, %v84_v30  ;;  %v302_v33 = vsel %vm187_vm0, %v161_v32, 0.0  ;;  %v180_v30 = vmul.f32 %v100_v21, %v100_v21  ;;  %v181_v32 = vmul.f32 %v101_v22, %v101_v22 }
  0x53   :  { %2108 = vmatprep.mubr.msk.f32.mxu0 %vm187_vm0, %v2420_v34  ;;  %2156 = vmatprep.mubr.msk.f32.mxu1 %vm187_vm0, %v85_v31  ;;  %v305_v34 = vsel %vm187_vm0, %v162_v35, 0.0  ;;  %v104_v31 = vld [vmem:[%s3956_s1 + $0x1e8] sm:$0xff]  ;;  %v106_v35 = vld [vmem:[%s3956_s1 + $0x1f8] sm:$0xff]  ;;  %s2273_s1 = smov [#allocation4]  }
  0x54   :  { %s1872_s7 = sshll.u32 %s2273_s1, 4  ;;  %s3724_s7 = int_to_ptr.vmem [resolvable:$true] %s1872_s7 }
  0x55   :  { %300 = vadd.xlane.f32.xlu1 %v299_v27  ;;  %303 = vadd.xlane.f32.xlu0 %v302_v33  ;;  %v185_v27 = vmul.f32 %v105_v26, %v105_v26  ;;  %v183_v33 = vmul.f32 %v103_v17, %v103_v17  ;;  %s2227_s8 = scalar_lea.vmem %s3724_s7, 16  ;;  %s2231_s9 = scalar_lea.vmem %s3724_s7, 32 }
  0x56   :  { %2109 = vmatmul.mubr.msk.f32.gmra.mxu0 %vm187_vm0, %v2438_v40  ;;  %2157 = vmatmul.mubr.msk.f32.gmra.mxu1 %vm187_vm0, %v86_v38  ;;  %v308_v40 = vsel %vm187_vm0, %v163_v42, 0.0  ;;  %v362_v38 = vsel %vm187_vm0, %v181_v32, 0.0  ;;  %v184_v42 = vmul.f32 %v104_v31, %v104_v31  ;;  %p2228_p0 = scmp.ne.s32.totalorder %s3724_s7, %s2227_s8  ;;  %p2232_p1 = scmp.lt.s32.totalorder %s3724_s7, %s3724_s7 }
  0x57   :  { %2111 = vmatprep.mubr.msk.f32.mxu0 %vm187_vm0, %v2443_v41  ;;  %2159 = vmatprep.mubr.msk.f32.mxu1 %vm187_vm0, %v87_v39  ;;  %v311_v41 = vsel %vm187_vm0, %v164_v43, 0.0  ;;  %v182_v39 = vmul.f32 %v102_v24, %v102_v24  ;;  %p2233_p2 = scmp.lt.s32.totalorder %s2231_s9, %s2227_s8 }
  0x58   :  { %v371_v43 = vsel %vm187_vm0, %v184_v42, 0.0 }
  0x59   :  { %306 = vadd.xlane.f32.xlu1 %v305_v34  ;;  %309 = vadd.xlane.f32.xlu0 %v308_v40  ;;  %v368_v34 = vsel %vm187_vm0, %v183_v33, 0.0  ;;  %p2234_p3 = por %p2233_p2, %p2232_p1 }
  0x5a   :  { %2112 = vmatmul.mubr.msk.f32.gmra.mxu0 %vm187_vm0, %v2461_v47  ;;  %2160 = vmatmul.mubr.msk.f32.gmra.mxu1 %vm187_vm0, %v88_v44  ;;  %v314_v47 = vsel %vm187_vm0, %v165_v49, 0.0 }
  0x5b   :  { %2114 = vmatprep.mubr.msk.f32.mxu0 %vm187_vm0, %v2466_v48  ;;  %2162 = vmatprep.mubr.msk.f32.mxu1 %vm187_vm0, %v89_v46  ;;  %v317_v48 = vsel %vm187_vm0, %v166_v50, 0.0  ;;  %p2235_p4 = pnand %p2234_p3, %p2228_p0 }
  0x5d   :  { %312 = vadd.xlane.f32.xlu1 %v311_v41  ;;  %315 = vadd.xlane.f32.xlu0 %v314_v47 }
  0x5e   :  { %2115 = vmatmul.mubr.msk.f32.gmra.mxu0 %vm187_vm0, %v2484_v54  ;;  %2163 = vmatmul.mubr.msk.f32.gmra.mxu1 %vm187_vm0, %v90_v53  ;;  %v320_v54 = vsel %vm187_vm0, %v167_v57, 0.0 }
  0x5f   :  { %2117 = vmatprep.mubr.msk.f32.mxu0 %vm187_vm0, %v2489_v55  ;;  %2165 = vmatprep.mubr.msk.f32.mxu1 %vm187_vm0, %v91_v56  ;;  %v323_v55 = vsel %vm187_vm0, %v168_v58, 0.0 }
  0x61   :  { %318 = vadd.xlane.f32.xlu1 %v317_v48  ;;  %321 = vadd.xlane.f32.xlu0 %v320_v54 }
  0x62   :  { %2118 = vmatmul.mubr.msk.f32.gmra.mxu0 %vm187_vm0, %v2507_v61  ;;  %2166 = vmatmul.mubr.msk.f32.gmra.mxu1 %vm187_vm0, %v92_v59  ;;  %v326_v61 = vsel %vm187_vm0, %v169_v1, 0.0 }
  0x63   :  { %2120 = vmatprep.mubr.msk.f32.mxu0 %vm187_vm0, %v2512_v62  ;;  %2168 = vmatprep.mubr.msk.f32.mxu1 %vm187_vm0, %v93_v0  ;;  %v329_v62 = vsel %vm187_vm0, %v170_v2, 0.0 }
  0x65   :  { %324 = vadd.xlane.f32.xlu1 %v323_v55  ;;  %327 = vadd.xlane.f32.xlu0 %v326_v61 }
  0x66   :  { %2121 = vmatmul.mubr.msk.f32.gmra.mxu0 %vm187_vm0, %v2530_v5  ;;  %2169 = vmatmul.mubr.msk.f32.gmra.mxu1 %vm187_vm0, %v94_v3  ;;  %v332_v5 = vsel %vm187_vm0, %v171_v4, 0.0 }
  0x67   :  { %2123 = vmatprep.mubr.msk.f32.mxu0 %vm187_vm0, %v2535_v8  ;;  %2171 = vmatprep.mubr.msk.f32.mxu1 %vm187_vm0, %v95_v9  ;;  %v335_v8 = vsel %vm187_vm0, %v172_v11, 0.0  ;;  %v2272_v11 = vmov 0  }
  0x68   :  { %42 = vst [vmem:[#allocation3] sm:$0x1] %v2272_v11 }
  0x69   :  { %330 = vadd.xlane.f32.xlu1 %v329_v62  ;;  %333 = vadd.xlane.f32.xlu0 %v332_v5  ;;  %v2271_v62 = vmov inf  }
  0x6a   :  { %2124 = vmatmul.mubr.msk.f32.gmra.mxu0 %vm187_vm0, %v2553_v16  ;;  %2172 = vmatmul.mubr.msk.f32.gmra.mxu1 %vm187_vm0, %v96_v12  ;;  %v338_v16 = vsel %vm187_vm0, %v173_v13, 0.0  ;;  %41 = vst [vmem:[#allocation2] sm:$0x1] %v2271_v62 }
  0x6b   :  { %2126 = vmatprep.mubr.msk.f32.mxu0 %vm187_vm0, %v2558_v18  ;;  %2174 = vmatprep.mubr.msk.f32.mxu1 %vm187_vm0, %v97_v6  ;;  %v341_v18 = vsel %vm187_vm0, %v174_v10, 0.0 }
  0x6d   :  { %336 = vadd.xlane.f32.xlu1 %v335_v8  ;;  %339 = vadd.xlane.f32.xlu0 %v338_v16 }
  0x6e   :  { %2127 = vmatmul.mubr.msk.f32.gmra.mxu0 %vm187_vm0, %v2576_v25  ;;  %2175 = vmatmul.mubr.msk.f32.gmra.mxu1 %vm187_vm0, %v98_v15  ;;  %v344_v25 = vsel %vm187_vm0, %v175_v19, 0.0 }
  0x6f   :  { %2129 = vmatprep.mubr.msk.f32.mxu0 %vm187_vm0, %v2581_v28  ;;  %2177 = vmatprep.mubr.msk.f32.mxu1 %vm187_vm0, %v99_v20  ;;  %v347_v28 = vsel %vm187_vm0, %v176_v7, 0.0 }
  0x71   :  { %342 = vadd.xlane.f32.xlu1 %v341_v18  ;;  %345 = vadd.xlane.f32.xlu0 %v344_v25 }
  0x72   :  { %2130 = vmatmul.mubr.msk.f32.gmra.mxu0 %vm187_vm0, %v2599_v36  ;;  %2178 = vmatmul.mubr.msk.f32.gmra.mxu1 %vm187_vm0, %v100_v21  ;;  %v350_v36 = vsel %vm187_vm0, %v177_v23, 0.0 }
  0x73   :  { %2132 = vmatprep.mubr.msk.f32.mxu0 %vm187_vm0, %v2604_v37  ;;  %2180 = vmatprep.mubr.msk.f32.mxu1 %vm187_vm0, %v101_v22  ;;  %v353_v37 = vsel %vm187_vm0, %v178_v14, 0.0 }
  0x75   :  { %348 = vadd.xlane.f32.xlu1 %v347_v28  ;;  %351 = vadd.xlane.f32.xlu0 %v350_v36 }
  0x76   :  { %2133 = vmatmul.mubr.msk.f32.gmra.mxu0 %vm187_vm0, %v2622_v45  ;;  %2181 = vmatmul.mubr.msk.f32.gmra.mxu1 %vm187_vm0, %v102_v24  ;;  %v356_v45 = vsel %vm187_vm0, %v179_v29, 0.0 }
  0x77   :  { %2135 = vmatprep.mubr.msk.f32.mxu0 %vm187_vm0, %v2635_v51  ;;  %2183 = vmatprep.mubr.msk.f32.mxu1 %vm187_vm0, %v103_v17  ;;  %v359_v51 = vsel %vm187_vm0, %v180_v30, 0.0 }
  0x79   :  { %354 = vadd.xlane.f32.xlu1 %v353_v37  ;;  %357 = vadd.xlane.f32.xlu0 %v356_v45 }
  0x7a   :  { %2136 = vmatmul.mubr.msk.f32.gmra.mxu0 %vm187_vm0, %v2640_v52  ;;  %2184 = vmatmul.mubr.msk.f32.gmra.mxu1 %vm187_vm0, %v104_v31  ;;  %v374_v52 = vsel %vm187_vm0, %v185_v27, 0.0 }
  0x7b   :  { %2138 = vmatprep.mubr.msk.f32.mxu0 %vm187_vm0, %v2658_v60  ;;  %2186 = vmatprep.mubr.msk.f32.mxu1 %vm187_vm0, %v105_v26  ;;  %v365_v60 = vsel %vm187_vm0, %v182_v39, 0.0 }
  0x7d   :  { %360 = vadd.xlane.f32.xlu1 %v359_v51  ;;  %363 = vadd.xlane.f32.xlu0 %v362_v38 }
  0x7e   :  { %2139 = vmatmul.mubr.msk.f32.gmra.mxu0 %vm187_vm0, %v2663_v63  ;;  %2187 = vmatmul.mubr.msk.f32.gmra.mxu1 %vm187_vm0, %v106_v35 }
  0x81   :  { %375 = vadd.xlane.f32.xlu1 %v374_v52  ;;  %366 = vadd.xlane.f32.xlu0 %v365_v60 }
  0x85   :  { %369 = vadd.xlane.f32.xlu1 %v368_v34  ;;  %372 = vadd.xlane.f32.xlu0 %v371_v43 }
  0x8f   :  { %v2886_v44 = vpop.xlane.xlu0 %189  ;;  %v2888_v63 = vpop.xlane.xlu1 %195 }
  0x93   :  { %v2890_v46 = vpop.xlane.xlu0 %192  ;;  %v2892_v40 = vpop.xlane.xlu1 %201 }
  0x97   :  { %v2894_v49 = vpop.xlane.xlu0 %204  ;;  %v2896_v41 = vpop.xlane.xlu1 %207 }
  0x9b   :  { %v2898_v50 = vpop.xlane.xlu0 %198  ;;  %v2900_v53 = vpop.xlane.xlu1 %210 }
  0x9f   :  { %v2902_v56 = vpop.xlane.xlu0 %213 }
  0xa6   :  { %v2904_v47 = vpop.xlane.xlu1 %216  ;;  %v2906_v57 = vpop.xlane.xlu0 %219 }
  0xaa   :  { %v2908_v48 = vpop.xlane.xlu1 %222  ;;  %v2910_v58 = vpop.xlane.xlu0 %225 }
  0xae   :  { %v2912_v59 = vpop.xlane.xlu1 %228  ;;  %v2914_v0 = vpop.xlane.xlu0 %231 }
  0xb2   :  { %v2916_v54 = vpop.xlane.xlu1 %234  ;;  %v2918_v1 = vpop.xlane.xlu0 %237 }
  0xb6   :  { %v2920_v55 = vpop.xlane.xlu1 %240  ;;  %v2922_v2 = vpop.xlane.xlu0 %243 }
  0xb7   :  { %4069 = vst [vmem:[#allocation10_spill] sm:$0xff] %v2922_v2 }
  0xba   :  { %v2924_v3 = vpop.xlane.xlu1 %246  ;;  %v2926_v9 = vpop.xlane.xlu0 %249 }
  0xbe   :  { %v2928_v61 = vpop.xlane.xlu1 %252  ;;  %v2930_v4 = vpop.xlane.xlu0 %255 }
  0xbf   :  { %4070 = vst [vmem:[#allocation11_spill] sm:$0xff] %v2930_v4 }
  0xc2   :  { %v2932_v12 = vpop.xlane.xlu1 %258  ;;  %v2934_v6 = vpop.xlane.xlu0 %261 }
  0xc3   :  { %4071 = vst [vmem:[#allocation12_spill] sm:$0xff] %v2932_v12 }
  0xc6   :  { %v2936_v5 = vpop.xlane.xlu1 %264  ;;  %v2938_v13 = vpop.xlane.xlu0 %267 }
  0xc7   :  { %4072 = vst [vmem:[#allocation13_spill] sm:$0xff] %v2938_v13 }
  0xca   :  { %v2940_v8 = vpop.xlane.xlu1 %270  ;;  %v2942_v10 = vpop.xlane.xlu0 %273 }
  0xcb   :  { %4073 = vst [vmem:[#allocation14_spill] sm:$0xff] %v2940_v8  ;;  %4074 = vst [vmem:[#allocation15_spill] sm:$0xff] %v2942_v10 }
  0xce   :  { %v2944_v15 = vpop.xlane.xlu1 %276  ;;  %v2946_v20 = vpop.xlane.xlu0 %279 }
  0xcf   :  { %4075 = vst [vmem:[#allocation16_spill] sm:$0xff] %v2946_v20 }
  0xd2   :  { %v2948_v16 = vpop.xlane.xlu1 %282  ;;  %v286_v19 = vpop.xlane.xlu0 %285 }
  0xd3   :  { %4076 = vst [vmem:[#allocation17_spill] sm:$0xff] %v2948_v16 }
  0xd6   :  { %v289_v18 = vpop.xlane.xlu1 %288  ;;  %v292_v7 = vpop.xlane.xlu0 %291 }
  0xda   :  { %v295_v21 = vpop.xlane.xlu1 %294  ;;  %v298_v22 = vpop.xlane.xlu0 %297 }
  0xde   :  { %v301_v29 = vpop.xlane.xlu1 %300  ;;  %v304_v45 = vpop.xlane.xlu0 %303 }
  0xe2   :  { %v307_v60 = vpop.xlane.xlu1 %306 }
 0x102   :  { %v2950_v25 = vpop.f32.mrf.mxu0  ;;  %v2143_v23 = vpop.f32.mrf.mxu1 }
 0x103   :  { %v1038_v28 = vmul.f32 2.0, %v2143_v23 }
 0x104   :  { %v2952_v14 = vpop.f32.mrf.mxu0  ;;  %v846_v24 = vpop.f32.mrf.mxu1 }
 0x105   :  { %v1037_v17 = vmul.f32 2.0, %v846_v24  ;;  %v2954_v36 = vsub.f32 %v289_v18, %v1038_v28 }
 0x106   :  { %v2956_v37 = vpop.f32.mrf.mxu0  ;;  %v2146_v30 = vpop.f32.mrf.mxu1 }
 0x107   :  { %4077 = vst [vmem:[#allocation18_spill] sm:$0xff] %v2954_v36  ;;  %v2958_v31 = vsub.f32 %v286_v19, %v1037_v17  ;;  %v1040_v26 = vmul.f32 2.0, %v2146_v30  ;;  %v310_v19 = vpop.xlane.xlu0 %309 }
 0x108   :  { %v2960_v32 = vpop.f32.mrf.mxu0  ;;  %v856_v51 = vpop.f32.mrf.mxu1 }
 0x109   :  { %4078 = vst [vmem:[#allocation19_spill] sm:$0xff] %v2958_v31  ;;  %v1550_v27 = vmin.f32 %v2958_v31, %v2954_v36  ;;  %v1039_v35 = vmul.f32 2.0, %v856_v51  ;;  %v2968_v33 = vsub.f32 %v295_v21, %v1040_v26  ;;  %v313_v51 = vpop.xlane.xlu1 %312 }
 0x10a   :  { %v2964_v38 = vpop.f32.mrf.mxu0  ;;  %v2149_v39 = vpop.f32.mrf.mxu1 }
 0x10b   :  { %v2966_v52 = vsub.f32 %v292_v7, %v1039_v35  ;;  %4080 = vst [vmem:[#allocation21_spill] sm:$0xff] %v2968_v33  ;;  %v1042_v34 = vmul.f32 2.0, %v2149_v39 }
 0x10c   :  { %v2970_v42 = vpop.f32.mrf.mxu0  ;;  %v866_v43 = vpop.f32.mrf.mxu1 }
 0x10d   :  { %4079 = vst [vmem:[#allocation20_spill] sm:$0xff] %v2966_v52  ;;  %v1554_v62 = vmin.f32 %v1550_v27, %v2966_v52  ;;  %v1041_v11 = vmul.f32 2.0, %v866_v43  ;;  %v2980_v17 = vsub.f32 %v301_v29, %v1042_v34  ;;  %v316_v52 = vpop.xlane.xlu0 %315 }
 0x10e   :  { %v2973_v18 = vpop.f32.mrf.mxu0  ;;  %v2152_v23 = vpop.f32.mrf.mxu1 }
 0x10f   :  { %v1558_v28 = vmin.f32 %v1554_v62, %v2968_v33  ;;  %v2978_v7 = vsub.f32 %v298_v22, %v1041_v11  ;;  %v1044_v21 = vmul.f32 2.0, %v2152_v23  ;;  %4082 = vst [vmem:[#allocation23_spill] sm:$0xff] %v2980_v17 }
 0x110   :  { %v2976_v24 = vpop.f32.mrf.mxu0  ;;  %v876_v30 = vpop.f32.mrf.mxu1 }
 0x111   :  { %4081 = vst [vmem:[#allocation22_spill] sm:$0xff] %v2978_v7  ;;  %v1043_v26 = vmul.f32 2.0, %v876_v30  ;;  %v1562_v27 = vmin.f32 %v1558_v28, %v2978_v7  ;;  %v2990_v11 = vsub.f32 %v307_v60, %v1044_v21  ;;  %v319_v28 = vpop.xlane.xlu1 %318  ;;  %v322_v21 = vpop.xlane.xlu0 %321 }
 0x112   :  { %v2982_v35 = vpop.f32.mrf.mxu0  ;;  %v2155_v39 = vpop.f32.mrf.mxu1 }
 0x113   :  { %v2985_v43 = vsub.f32 %v304_v45, %v1043_v26  ;;  %v1566_v62 = vmin.f32 %v1562_v27, %v2980_v17  ;;  %v1046_v22 = vmul.f32 2.0, %v2155_v39  ;;  %4084 = vst [vmem:[#allocation25_spill] sm:$0xff] %v2990_v11 }
 0x114   :  { %v2987_v36 = vpop.f32.mrf.mxu0  ;;  %v886_v29 = vpop.f32.mrf.mxu1 }
 0x115   :  { %4083 = vst [vmem:[#allocation24_spill] sm:$0xff] %v2985_v43  ;;  %v1045_v34 = vmul.f32 2.0, %v886_v29  ;;  %v1570_v30 = vmin.f32 %v1566_v62, %v2985_v43  ;;  %v3000_v20 = vsub.f32 %v313_v51, %v1046_v22  ;;  %v325_v22 = vpop.xlane.xlu1 %324 }
 0x116   :  { %v2992_v23 = vpop.f32.mrf.mxu0  ;;  %v2158_v33 = vpop.f32.mrf.mxu1 }
 0x117   :  { %v2995_v31 = vsub.f32 %v310_v19, %v1045_v34  ;;  %v1549_v26 = vmin.f32 %v2990_v11, %v1570_v30  ;;  %v1048_v7 = vmul.f32 2.0, %v2158_v33  ;;  %4086 = vst [vmem:[#allocation27_spill] sm:$0xff] %v3000_v20 }
 0x118   :  { %v2997_v45 = vpop.f32.mrf.mxu0  ;;  %v896_v27 = vpop.f32.mrf.mxu1 }
 0x119   :  { %4085 = vst [vmem:[#allocation26_spill] sm:$0xff] %v2995_v31  ;;  %v1047_v60 = vmul.f32 2.0, %v896_v27  ;;  %v1553_v29 = vmin.f32 %v1549_v26, %v2995_v31  ;;  %v3010_v13 = vsub.f32 %v319_v28, %v1048_v7  ;;  %v328_v26 = vpop.xlane.xlu0 %327 }
 0x11a   :  { %v3002_v39 = vpop.f32.mrf.mxu0  ;;  %v2161_v17 = vpop.f32.mrf.mxu1 }
 0x11b   :  { %v3005_v62 = vsub.f32 %v316_v52, %v1047_v60  ;;  %v1557_v34 = vmin.f32 %v1553_v29, %v3000_v20  ;;  %v1050_v43 = vmul.f32 2.0, %v2161_v17  ;;  %4088 = vst [vmem:[#allocation29_spill] sm:$0xff] %v3010_v13 }
 0x11c   :  { %v3007_v19 = vpop.f32.mrf.mxu0  ;;  %v906_v33 = vpop.f32.mrf.mxu1 }
 0x11d   :  { %4087 = vst [vmem:[#allocation28_spill] sm:$0xff] %v3005_v62  ;;  %v1049_v51 = vmul.f32 2.0, %v906_v33  ;;  %v1552_v27 = vmin.f32 %v3005_v62, %v1557_v34  ;;  %v3020_v31 = vsub.f32 %v325_v22, %v1050_v43  ;;  %v331_v34 = vpop.xlane.xlu1 %330  ;;  %v1010_v43 = vmul.f32 2.0, %v2964_v38 }
 0x11e   :  { %v3012_v30 = vpop.f32.mrf.mxu0  ;;  %v2164_v11 = vpop.f32.mrf.mxu1  ;;  %v1012_v38 = vmul.f32 2.0, %v2973_v18 }
 0x11f   :  { %v3015_v16 = vsub.f32 %v322_v21, %v1049_v51  ;;  %v1556_v60 = vmin.f32 %v1552_v27, %v3010_v13  ;;  %4090 = vst [vmem:[#allocation31_spill] sm:$0xff] %v3020_v31  ;;  %v1052_v20 = vmul.f32 2.0, %v2164_v11  ;;  %v1009_v11 = vmul.f32 2.0, %v2970_v42 }
 0x120   :  { %v3017_v52 = vpop.f32.mrf.mxu0  ;;  %v916_v17 = vpop.f32.mrf.mxu1  ;;  %v1007_v13 = vmul.f32 2.0, %v2960_v32 }
 0x121   :  { %4089 = vst [vmem:[#allocation30_spill] sm:$0xff] %v3015_v16  ;;  %v1051_v7 = vmul.f32 2.0, %v916_v17  ;;  %v1560_v29 = vmin.f32 %v1556_v60, %v3015_v16  ;;  %v3030_v27 = vsub.f32 %v331_v34, %v1052_v20  ;;  %v334_v17 = vpop.xlane.xlu0 %333  ;;  %v1006_v16 = vmul.f32 2.0, %v2950_v25  ;;  %v337_v25 = vpop.xlane.xlu1 %336 }
 0x122   :  { %v2119_v28 = vpop.f32.mrf.mxu0  ;;  %v2167_v33 = vpop.f32.mrf.mxu1  ;;  %v3043_v34 = vsub.f32 %v2894_v49, %v1010_v43  ;;  %v1011_v49 = vmul.f32 2.0, %v2976_v24 }
 0x123   :  { %v3023_v4 = vsub.f32 %v328_v26, %v1051_v7  ;;  %v1564_v21 = vmin.f32 %v1560_v29, %v3020_v31  ;;  %4092 = vst [vmem:[#allocation33_spill] sm:$0xff] %v3030_v27  ;;  %v1005_v29 = vmul.f32 2.0, %v2952_v14  ;;  %v1008_v31 = vmul.f32 2.0, %v2956_v37 }
 0x124   :  { %v766_v62 = vpop.f32.mrf.mxu0  ;;  %v926_v51 = vpop.f32.mrf.mxu1  ;;  %v1054_v42 = vmul.f32 2.0, %v2167_v33  ;;  %v3049_v14 = vsub.f32 %v2892_v40, %v1009_v11  ;;  %v1014_v37 = vmul.f32 2.0, %v2982_v35  ;;  %v3053_v18 = vsub.f32 %v2890_v46, %v1006_v16 }
 0x125   :  { %4091 = vst [vmem:[#allocation32_spill] sm:$0xff] %v3023_v4  ;;  %v1568_v22 = vmin.f32 %v1564_v21, %v3023_v4  ;;  %v1053_v60 = vmul.f32 2.0, %v926_v51  ;;  %v3056_v12 = vsub.f32 %v2886_v44, %v1005_v29  ;;  %v1013_v33 = vmul.f32 2.0, %v2987_v36 }
 0x126   :  { %v3026_v8 = vpop.f32.mrf.mxu0  ;;  %v2170_v2 = vpop.f32.mrf.mxu1  ;;  %v3061_v43 = vsub.f32 %v2898_v50, %v1008_v31  ;;  %v3064_v40 = vsub.f32 %v2888_v63, %v1007_v13  ;;  %v3067_v35 = vsub.f32 %v2900_v53, %v1012_v38  ;;  %v1522_v44 = vmin.f32 %v3053_v18, %v3043_v34 }
 0x127   :  { %v1572_v51 = vmin.f32 %v1568_v22, %v3030_v27  ;;  %v3046_v4 = vsub.f32 %v334_v17, %v1053_v60  ;;  %v1018_v22 = vmul.f32 2.0, %v3002_v39  ;;  %v3075_v36 = vsub.f32 %v337_v25, %v1054_v42  ;;  %v340_v50 = vpop.xlane.xlu0 %339 }
 0x128   :  { %v3033_v26 = vpop.f32.mrf.mxu0  ;;  %v936_v7 = vpop.f32.mrf.mxu1  ;;  %v1521_v63 = vmin.f32 %v3056_v12, %v3049_v14  ;;  %v3080_v53 = vsub.f32 %v2904_v47, %v1014_v37  ;;  %v1016_v13 = vmul.f32 2.0, %v2992_v23  ;;  %v1022_v39 = vmul.f32 2.0, %v2119_v28 }
 0x129   :  { %4093 = vst [vmem:[#allocation34_spill] sm:$0xff] %v3046_v4  ;;  %v1551_v24 = vmin.f32 %v3046_v4, %v1572_v51  ;;  %4094 = vst [vmem:[#allocation35_spill] sm:$0xff] %v3075_v36  ;;  %v1055_v31 = vmul.f32 2.0, %v936_v7  ;;  %v3088_v11 = vsub.f32 %v2896_v41, %v1011_v49  ;;  %v3091_v29 = vsub.f32 %v2902_v56, %v1013_v33 }
 0x12a   :  { %v2125_v21 = vpop.f32.mrf.mxu0  ;;  %v3040_v20 = vpop.f32.mrf.mxu1  ;;  %v1015_v7 = vmul.f32 2.0, %v2997_v45  ;;  %v1017_v38 = vmul.f32 2.0, %v3007_v19  ;;  %v1524_v47 = vmin.f32 %v3061_v43, %v3067_v35  ;;  %v3098_v23 = vsub.f32 %v2912_v59, %v1018_v22 }
 0x12b   :  { %v1020_v28 = vmul.f32 2.0, %v3012_v30  ;;  %v1026_v42 = vmul.f32 2.0, %v2125_v21  ;;  %v1021_v41 = vmul.f32 2.0, %v766_v62  ;;  %v1056_v37 = vmul.f32 2.0, %v2170_v2  ;;  %v343_v45 = vpop.xlane.xlu1 %342 }
 0x12c   :  { %v786_v32 = vpop.f32.mrf.mxu0  ;;  %v946_v10 = vpop.f32.mrf.mxu1  ;;  %v1555_v56 = vmin.f32 %v1551_v24, %v3075_v36  ;;  %v3104_v49 = vsub.f32 %v340_v50, %v1055_v31  ;;  %v1526_v19 = vmin.f32 %v1522_v44, %v3080_v53  ;;  %v3108_v33 = vsub.f32 %v2908_v48, %v1016_v13 }
 0x12d   :  { %v3111_v59 = vsub.f32 %v2920_v55, %v1022_v39  ;;  %v1523_v2 = vmin.f32 %v3064_v40, %v3088_v11  ;;  %v1525_v62 = vmin.f32 %v1521_v63, %v3091_v29  ;;  %v3119_v24 = vsub.f32 %v2906_v57, %v1015_v7 }
 0x12e   :  { %v2128_v46 = vpop.f32.mrf.mxu0  ;;  %v3070_v16 = vpop.f32.mrf.mxu1  ;;  %4095 = vst [vmem:[#allocation36_spill] sm:$0xff] %v3104_v49  ;;  %v3122_v44 = vsub.f32 %v2910_v58, %v1017_v38  ;;  %v1530_v48 = vmin.f32 %v1526_v19, %v3098_v23  ;;  %v3126_v55 = vsub.f32 %v2916_v54, %v1020_v28  ;;  %v3129_v50 = vsub.f32 %v2928_v61, %v1026_v42 }
 0x12f   :  { %v1025_v31 = vmul.f32 2.0, %v786_v32  ;;  %v3134_v63 = vsub.f32 %v2918_v1, %v1021_v41  ;;  %v1559_v57 = vmin.f32 %v1555_v56, %v3104_v49  ;;  %v3137_v7 = vsub.f32 %v343_v45, %v1056_v37  ;;  %v346_v58 = vpop.xlane.xlu0 %345 }
 0x130   :  { %v3083_v17 = vpop.f32.mrf.mxu0  ;;  %v3085_v60 = vpop.f32.mrf.mxu1  ;;  %v1057_v38 = vmul.f32 2.0, %v946_v10  ;;  %v1534_v54 = vmin.f32 %v1530_v48, %v3111_v59  ;;  %v1024_v61 = vmul.f32 2.0, %v3026_v8  ;;  %v1527_v1 = vmin.f32 %v1523_v2, %v3119_v24 }
 0x131   :  { %4096 = vst [vmem:[#allocation37_spill] sm:$0xff] %v3137_v7  ;;  %v1529_v41 = vmin.f32 %v1525_v62, %v3122_v44  ;;  %v1019_v37 = vmul.f32 2.0, %v3017_v52  ;;  %v3153_v45 = vsub.f32 %v2926_v9, %v1025_v31  ;;  %v1028_v8 = vmul.f32 2.0, %v2128_v46 }
 0x132   :  { %v2131_v51 = vpop.f32.mrf.mxu0  ;;  %v3101_v25 = vpop.f32.mrf.mxu1  ;;  %v1574_v2 = vmin.f32 %v3137_v7, %v1559_v57  ;;  %v3159_v48 = vsub.f32 %v346_v58, %v1057_v38  ;;  %v1058_v46 = vmul.f32 2.0, %v3040_v20  ;;  %v1027_v20 = vmul.f32 2.0, %v3083_v17 }
 0x133   :  { %v1030_v30 = vmul.f32 2.0, %v2131_v51  ;;  %v1528_v51 = vmin.f32 %v1524_v47, %v3108_v33  ;;  %v1538_v47 = vmin.f32 %v1534_v54, %v3129_v50  ;;  %4098 = vst [vmem:[#allocation39_spill] sm:$0xff] %v3153_v45  ;;  %v352_v52 = vpop.xlane.xlu0 %351  ;;  %v349_v38 = vpop.xlane.xlu1 %348 }
 0x134   :  { %v806_v21 = vpop.f32.mrf.mxu0  ;;  %v3113_v22 = vpop.f32.mrf.mxu1  ;;  %4099 = vst [vmem:[#allocation40_spill] sm:$0xff] %v3159_v48 }
 0x135   :  { %v3143_v32 = vsub.f32 %v2936_v5, %v1030_v30  ;;  %v1029_v56 = vmul.f32 2.0, %v806_v21  ;;  %v1532_v10 = vmin.f32 %v1528_v51, %v3126_v55  ;;  %v1533_v30 = vmin.f32 %v1529_v41, %v3134_v63 }
 0x136   :  { %v2134_v13 = vpop.f32.mrf.mxu0  ;;  %v3131_v39 = vpop.f32.mrf.mxu1  ;;  %v3162_v21 = vsub.f32 %v2924_v3, %v1024_v61  ;;  %v1023_v51 = vmul.f32 2.0, %v3033_v26  ;;  %v3176_v3 = vsub.f32 %v2914_v0, %v1019_v37  ;;  %v4103_v61 = vld [vmem:[#allocation12_spill] sm:$0xff]  ;;  %v4107_v37 = vld [vmem:[#allocation10_spill] sm:$0xff] }
 0x137   :  { %4097 = vst [vmem:[#allocation38_spill] sm:$0xff] %v3143_v32  ;;  %v1542_v9 = vmin.f32 %v1538_v47, %v3143_v32  ;;  %v3170_v41 = vsub.f32 %v2934_v6, %v1029_v56  ;;  %v1032_v57 = vmul.f32 2.0, %v2134_v13  ;;  %v1537_v26 = vmin.f32 %v1533_v30, %v3153_v45 }
 0x138   :  { %v816_v28 = vpop.f32.mrf.mxu0  ;;  %v3145_v42 = vpop.f32.mrf.mxu1  ;;  %4100 = vst [vmem:[#allocation41_spill] sm:$0xff] %v3162_v21  ;;  %v3180_v47 = vsub.f32 %v4103_v61, %v1028_v8  ;;  %v1563_v6 = vmin.f32 %v3159_v48, %v1574_v2  ;;  %v1536_v0 = vmin.f32 %v1532_v10, %v3162_v21  ;;  %v3192_v30 = vsub.f32 %v349_v38, %v1058_v46  ;;  %v4108_v61 = vld [vmem:[#allocation14_spill] sm:$0xff]  ;;  %v4110_v10 = vld [vmem:[#allocation11_spill] sm:$0xff] }
 0x139   :  { %4101 = vst [vmem:[#allocation42_spill] sm:$0xff] %v3170_v41  ;;  %v1059_v8 = vmul.f32 2.0, %v3085_v60  ;;  %v3197_v2 = vsub.f32 %v4108_v61, %v1032_v57  ;;  %v358_v46 = vpop.xlane.xlu0 %357 }
 0x13a   :  { %v2137_v5 = vpop.f32.mrf.mxu0  ;;  %v3155_v19 = vpop.f32.mrf.mxu1  ;;  %4104 = vst [vmem:[#allocation12_spill] sm:$0xff] %v3180_v47 }
 0x13b   :  { %v1034_v62 = vmul.f32 2.0, %v2137_v5  ;;  %4109 = vst [vmem:[#allocation10_spill] sm:$0xff] %v3197_v2  ;;  %v3215_v61 = vsub.f32 %v352_v52, %v1059_v8  ;;  %v1061_v52 = vmul.f32 2.0, %v3113_v22  ;;  %v1062_v8 = vmul.f32 2.0, %v3101_v25 }
 0x13c   :  { %v826_v31 = vpop.f32.mrf.mxu0  ;;  %v3167_v54 = vpop.f32.mrf.mxu1 }
 0x13d   :  { %v3173_v58 = vsub.f32 %v2944_v15, %v1034_v62  ;;  %v1033_v5 = vmul.f32 2.0, %v826_v31  ;;  %v4105_v15 = vld [vmem:[#allocation15_spill] sm:$0xff]  ;;  %v3190_v31 = vsub.f32 %v4107_v37, %v1023_v51  ;;  %v355_v51 = vpop.xlane.xlu1 %354  ;;  %v4112_v37 = vld [vmem:[#allocation17_spill] sm:$0xff] }
 0x13e   :  { %v2140_v7 = vpop.f32.mrf.mxu0  ;;  %v2188_v49 = vpop.f32.mrf.mxu1 }
 0x13f   :  { %4102 = vst [vmem:[#allocation43_spill] sm:$0xff] %v3173_v58  ;;  %v1546_v13 = vmin.f32 %v1542_v9, %v3173_v58  ;;  %v3186_v56 = vsub.f32 %v4105_v15, %v1033_v5  ;;  %v1036_v62 = vmul.f32 2.0, %v2140_v7  ;;  %v1541_v49 = vmin.f32 %v1537_v26, %v3170_v41 }
 0x140   :  { %v836_v17 = vpop.f32.mrf.mxu0  ;;  %v1031_v9 = vmul.f32 2.0, %v816_v28  ;;  %v1531_v5 = vmin.f32 %v1527_v1, %v3176_v3  ;;  %v1540_v7 = vmin.f32 %v1536_v0, %v3180_v47  ;;  %v3202_v15 = vsub.f32 %v4110_v10, %v1027_v20 }
 0x141   :  { %4106 = vst [vmem:[#allocation15_spill] sm:$0xff] %v3186_v56  ;;  %v1567_v48 = vmin.f32 %v1563_v6, %v1546_v13  ;;  %v1545_v60 = vmin.f32 %v1541_v49, %v3186_v56  ;;  %v3207_v26 = vsub.f32 %v4112_v37, %v1036_v62  ;;  %v1035_v57 = vmul.f32 2.0, %v836_v17  ;;  %v4114_v13 = vld [vmem:[#allocation13_spill] sm:$0xff]  ;;  %v361_v10 = vpop.xlane.xlu1 %360  ;;  %v4116_v17 = vld [vmem:[#allocation16_spill] sm:$0xff] }
 0x142   :  { %4111 = vst [vmem:[#allocation14_spill] sm:$0xff] %v3202_v15  ;;  %v1535_v28 = vmin.f32 %v1531_v5, %v3190_v31  ;;  %v1060_v6 = vmul.f32 2.0, %v3070_v16  ;;  %v1544_v1 = vmin.f32 %v1540_v7, %v3197_v2  ;;  %v3213_v0 = vsub.f32 %v4114_v13, %v1031_v9  ;;  %v364_v16 = vpop.xlane.xlu0 %363 }
 0x143   :  { %v1571_v38 = vmin.f32 %v1567_v48, %v3192_v30  ;;  %4113 = vst [vmem:[#allocation11_spill] sm:$0xff] %v3207_v26  ;;  %v3221_v37 = vsub.f32 %v4116_v17, %v1035_v57  ;;  %v1135_v5 = vlaneseq  ;;  %v3232_v13 = vsub.f32 %v358_v46, %v1061_v52 }
 0x144   :  { %4115 = vst [vmem:[#allocation17_spill] sm:$0xff] %v3213_v0  ;;  %v1539_v48 = vmin.f32 %v1535_v28, %v3202_v15  ;;  %v1548_v62 = vmin.f32 %v1544_v1, %v3207_v26  ;;  %v3224_v9 = vsub.f32 %v355_v51, %v1060_v6  ;;  %v3243_v6 = vsub.f32 %v361_v10, %v1062_v8 }
 0x145   :  { %v1575_v20 = vmin.f32 %v1571_v38, %v1545_v60  ;;  %4117 = vst [vmem:[#allocation13_spill] sm:$0xff] %v3221_v37  ;;  %v3230_v28 = vshrl.u32 %v1135_v5, 7  ;;  %v376_v1 = vpop.xlane.xlu1 %375 }
 0x146   :  { %v1543_v7 = vmin.f32 %v1539_v48, %v3213_v0  ;;  %v367_v22 = vpop.xlane.xlu0 %366  ;;  %4118 = vst [vmem:[#allocation16_spill] sm:$0xff] %v3243_v6 }
 0x147   :  { %v1576_v49 = vmin.f32 %v3215_v61, %v1575_v20  ;;  %v1063_v20 = vmul.f32 2.0, %v3145_v42  ;;  %v3236_v48 = vadd.s32 8, %v3230_v28  ;;  %v3239_v51 = vadd.s32 24, %v3230_v28 }
 0x148   :  { %v1547_v60 = vmin.f32 %v1543_v7, %v3221_v37  ;;  %v1065_v42 = vmul.f32 2.0, %v3167_v54  ;;  %v3257_v8 = vadd.s32 496, %v3230_v28  ;;  %v3263_v54 = vadd.s32 40, %v3230_v28 }
 0x149   :  { %v1561_v36 = vmin.f32 %v1548_v62, %v1576_v49  ;;  %v996_v49 = vpop.f32.mrf.mxu1  ;;  %v3246_v46 = vsub.f32 %v364_v16, %v1063_v20  ;;  %v370_v52 = vpop.xlane.xlu1 %369  ;;  %v3260_v16 = vadd.s32 16, %v3230_v28  ;;  %v3269_v20 = vadd.s32 56, %v3230_v28 }
 0x14a   :  { %v3284_v7 = vadd.s32 264, %v3230_v28  ;;  %v3287_v17 = vadd.s32 64, %v3230_v28  ;;  %vm1327_vm1 = vcmp.lt.s32.totalorder %v3257_v8, 500  ;;  %v3329_v26 = vadd.s32 296, %v3230_v28 }
 0x14b   :  { %v1565_v38 = vmin.f32 %v1561_v36, %v3224_v9  ;;  %v1064_v36 = vmul.f32 2.0, %v3131_v39  ;;  %4119 = vst [vmem:[#allocation44_spill] sm:$0xff] %v3246_v46  ;;  %v1066_v39 = vmul.f32 2.0, %v3155_v19  ;;  %v3272_v19 = vadd.s32 48, %v3230_v28 }
 0x14c   :  { %4123 = vst [vmem:[#allocation48_spill] sm:$0xff] %v3284_v7  ;;  %4131 = vst [vmem:[#allocation56_spill] sm:$0xff] %v3329_v26  ;;  %v3347_v37 = vadd.s32 320, %v3230_v28  ;;  %v3357_v7 = vadd.s32 128, %v3230_v28  ;;  %v3363_v56 = vadd.s32 152, %v3230_v28  ;;  %v3388_v15 = vadd.s32 168, %v3230_v28 }
 0x14d   :  { %v1569_v57 = vmin.f32 %v1565_v38, %v1547_v60  ;;  %v1067_v38 = vmul.f32 2.0, %v996_v49  ;;  %v3254_v10 = vsub.f32 %v367_v22, %v1064_v36  ;;  %v3275_v22 = vadd.s32 256, %v3230_v28 }
 0x14e   :  { %v3278_v49 = vsub.f32 %v370_v52, %v1065_v42  ;;  %v3298_v52 = vadd.s32 88, %v3230_v28  ;;  %v3323_v42 = vadd.s32 288, %v3230_v28  ;;  %4137 = vst [vmem:[#allocation62_spill] sm:$0xff] %v3347_v37  ;;  %4140 = vst [vmem:[#allocation65_spill] sm:$0xff] %v3357_v7  ;;  %v3397_v41 = vadd.s32 368, %v3230_v28 }
 0x14f   :  { %v1573_v25 = vmin.f32 %v1569_v57, %v3232_v13  ;;  %4120 = vst [vmem:[#allocation45_spill] sm:$0xff] %v3254_v10  ;;  %v3266_v57 = vadd.s32 32, %v3230_v28  ;;  %4121 = vst [vmem:[#allocation46_spill] sm:$0xff] %v3275_v22  ;;  %v1131_v5 = vsub.f32 %v376_v1, %v1067_v38  ;;  %v3360_v22 = vadd.s32 336, %v3230_v28 }
 0x150   :  { %4122 = vst [vmem:[#allocation47_spill] sm:$0xff] %v3278_v49  ;;  %4126 = vst [vmem:[#allocation51_spill] sm:$0xff] %v3298_v52  ;;  %v3400_v52 = vadd.s32 184, %v3230_v28  ;;  %v3403_v45 = vadd.s32 376, %v3230_v28  ;;  %v3406_v0 = vadd.s32 176, %v3230_v28  ;;  %v3416_v37 = vadd.s32 392, %v3230_v28 }
 0x151   :  { %v1577_v62 = vmin.f32 %v1573_v25, %v3243_v6  ;;  %v373_v25 = vpop.xlane.xlu0 %372  ;;  %v3313_v27 = vsel %vm1327_vm1, %v1131_v5, inf  ;;  %4129 = vst [vmem:[#allocation54_spill] sm:$0xff] %v3323_v42  ;;  %v3326_v5 = vadd.s32 104, %v3230_v28  ;;  %4141 = vst [vmem:[#allocation66_spill] sm:$0xff] %v3360_v22  ;;  %v3409_v42 = vadd.s32 384, %v3230_v28 }
 0x152   :  { %v3293_v4 = vsub.f32 %v373_v25, %v1066_v39  ;;  %4128 = vst [vmem:[#allocation53_spill] sm:$0xff] %v3313_v27  ;;  %v3341_v39 = vadd.s32 312, %v3230_v28  ;;  %4142 = vst [vmem:[#allocation67_spill] sm:$0xff] %v3363_v56  ;;  %v3412_v22 = vadd.s32 200, %v3230_v28  ;;  %v3453_v56 = vadd.s32 232, %v3230_v28 }
 0x153   :  { %v1578_v60 = vmin.f32 %v3246_v46, %v1577_v62  ;;  %v3281_v62 = vadd.s32 72, %v3230_v28  ;;  %v3290_v46 = vadd.s32 272, %v3230_v28  ;;  %4130 = vst [vmem:[#allocation55_spill] sm:$0xff] %v3326_v5  ;;  %4146 = vst [vmem:[#allocation71_spill] sm:$0xff] %v3397_v41  ;;  %v3456_v7 = vadd.s32 424, %v3230_v28 }
 0x154   :  { %4125 = vst [vmem:[#allocation50_spill] sm:$0xff] %v3293_v4  ;;  %4135 = vst [vmem:[#allocation60_spill] sm:$0xff] %v3341_v39  ;;  %v3419_v39 = vadd.s32 192, %v3230_v28  ;;  %v3473_v21 = vadd.s32 240, %v3230_v28  ;;  %v3511_v58 = vadd.s32 480, %v3230_v28 }
 0x155   :  { %v1581_v36 = vmin.f32 %v3254_v10, %v1578_v60  ;;  %4124 = vst [vmem:[#allocation49_spill] sm:$0xff] %v3290_v46  ;;  %v3301_v60 = vadd.s32 280, %v3230_v28  ;;  %v3304_v10 = vadd.s32 80, %v3230_v28  ;;  %v3382_v46 = vadd.s32 144, %v3230_v28  ;;  %4147 = vst [vmem:[#allocation72_spill] sm:$0xff] %v3400_v52 }
 0x156   :  { %4148 = vst [vmem:[#allocation73_spill] sm:$0xff] %v3403_v45  ;;  %4149 = vst [vmem:[#allocation74_spill] sm:$0xff] %v3406_v0 }
 0x157   :  { %v1579_v6 = vmin.f32 %v3278_v49, %v1581_v36  ;;  %4127 = vst [vmem:[#allocation52_spill] sm:$0xff] %v3301_v60  ;;  %v3332_v49 = vadd.s32 96, %v3230_v28  ;;  %v3344_v36 = vadd.s32 112, %v3230_v28  ;;  %4150 = vst [vmem:[#allocation75_spill] sm:$0xff] %v3409_v42  ;;  %v3484_v42 = vadd.s32 464, %v3230_v28 }
 0x158   :  { %4151 = vst [vmem:[#allocation76_spill] sm:$0xff] %v3412_v22  ;;  %4152 = vst [vmem:[#allocation77_spill] sm:$0xff] %v3416_v37  ;;  %v3481_v37 = vadd.s32 456, %v3230_v28 }
 0x159   :  { %v1582_v25 = vmin.f32 %v1579_v6, %v3293_v4  ;;  %4132 = vst [vmem:[#allocation57_spill] sm:$0xff] %v3332_v49  ;;  %v3338_v6 = vadd.s32 120, %v3230_v28  ;;  %4136 = vst [vmem:[#allocation61_spill] sm:$0xff] %v3344_v36  ;;  %v3353_v4 = vadd.s32 328, %v3230_v28  ;;  %v3450_v49 = vadd.s32 416, %v3230_v28 }
 0x15a   :  { %4153 = vst [vmem:[#allocation78_spill] sm:$0xff] %v3419_v39  ;;  %v3459_v36 = vadd.s32 224, %v3230_v28  ;;  %v3523_v39 = vld [vmem:[#allocation2] sm:$0x1] }
 0x15b   :  { %v1583_v38 = vmin.f32 %v3313_v27, %v1582_v25  ;;  %v3335_v25 = vadd.s32 304, %v3230_v28  ;;  %4134 = vst [vmem:[#allocation59_spill] sm:$0xff] %v3338_v6  ;;  %v3350_v27 = vadd.s32 136, %v3230_v28  ;;  %4139 = vst [vmem:[#allocation64_spill] sm:$0xff] %v3353_v4  ;;  %v3441_v4 = vadd.s32 216, %v3230_v28 }
 0x15c   :  { %v3467_v6 = vadd.s32 248, %v3230_v28 }
 0x15d   :  { %v1584_v1 = vrot.slane %v1583_v38, 4  ;;  %4133 = vst [vmem:[#allocation58_spill] sm:$0xff] %v3335_v25  ;;  %4138 = vst [vmem:[#allocation63_spill] sm:$0xff] %v3350_v27  ;;  %v3422_v25 = vadd.s32 400, %v3230_v28  ;;  %v3462_v27 = vadd.s32 432, %v3230_v28 }
 0x15e   :  { %4155 = vst [vmem:[#allocation80_spill] sm:$0xff] %v3441_v4  ;;  %v1685_v41 = vcvt.s32.f32 %v3467_v6  ;;  %v1684_v4 = vcvt.s32.f32 %v3473_v21 }
 0x15f   :  { %v1585_v60 = vmin.f32 %v1583_v38, %v1584_v1  ;;  %v3379_v1 = vadd.s32 344, %v3230_v28  ;;  %v3385_v38 = vadd.s32 352, %v3230_v28  ;;  %4154 = vst [vmem:[#allocation79_spill] sm:$0xff] %v3422_v25  ;;  %v3478_v25 = vadd.s32 448, %v3230_v28 }
 0x161   :  { %v1586_v47 = vrot.slane %v1585_v60, 2  ;;  %4143 = vst [vmem:[#allocation68_spill] sm:$0xff] %v3379_v1  ;;  %4144 = vst [vmem:[#allocation69_spill] sm:$0xff] %v3385_v38  ;;  %v3470_v1 = vadd.s32 440, %v3230_v28  ;;  %v3494_v38 = vadd.s32 504, %v3230_v28 }
 0x163   :  { %v1587_v2 = vmin.f32 %v1585_v60, %v1586_v47  ;;  %v3391_v47 = vadd.s32 360, %v3230_v28  ;;  %v3394_v60 = vadd.s32 160, %v3230_v28 }
 0x165   :  { %4145 = vst [vmem:[#allocation70_spill] sm:$0xff] %v3391_v47  ;;  %v1588_v26 = vrot.slane %v1587_v2, 1  ;;  %v3491_v47 = vadd.s32 472, %v3230_v28 }
 0x167   :  { %v3431_v5 = vmin.f32 %v1587_v2, %v1588_v26  ;;  %v3444_v2 = vadd.s32 408, %v3230_v28  ;;  %v3447_v26 = vadd.s32 208, %v3230_v28 }
 0x169   :  { %4156 = vst [vmem:[#allocation81_spill] sm:$0xff] %v3444_v2  ;;  %vm1611_vm2 = vcmp.eq.f32.partialorder %v3129_v50, %v3431_v5  ;;  %vm1615_vm3 = vcmp.eq.f32.partialorder %v3143_v32, %v3431_v5  ;;  %vm1590_vm5 = vcmp.eq.f32.partialorder %v3056_v12, %v3431_v5  ;;  %vm1591_vm6 = vcmp.eq.f32.partialorder %v3053_v18, %v3431_v5  ;;  %v4213_v50 = vld [vmem:[#allocation32_spill] sm:$0xff] }
 0x16a   :  { %vm1592_vm10 = vcmp.eq.f32.partialorder %v3064_v40, %v3431_v5  ;;  %vm1594_vm11 = vcmp.eq.f32.partialorder %v3049_v14, %v3431_v5  ;;  %vm1595_vm12 = vcmp.eq.f32.partialorder %v3043_v34, %v3431_v5  ;;  %v3534_v12 = vadd.s32 488, %v3230_v28  ;;  %v4218_v2 = vld [vmem:[#allocation76_spill] sm:$0xff] }
 0x16b   :  { %vm1593_vm14 = vcmp.eq.f32.partialorder %v3061_v43, %v3431_v5  ;;  %vm1596_vm15 = vcmp.eq.f32.partialorder %v3088_v11, %v3431_v5  ;;  %vm1597_vm0 = vcmp.eq.f32.partialorder %v3067_v35, %v3431_v5  ;;  %vm1598_vm1 = vcmp.eq.f32.partialorder %v3091_v29, %v3431_v5 }
 0x16c   :  { %v4157_v34 = vcvt.s32.f32 %v3230_v28  ;;  %v4158_v18 = vcvt.s32.f32 %v3236_v48  ;;  %vm4068_vm13 = vcmp.lt.f32.partialorder %v3431_v5, %v3523_v39  ;;  %v4159_v43 = vcvt.s32.f32 %v3260_v16 }
 0x16d   :  { %v4160_v11 = vcvt.s32.f32 %v3266_v57  ;;  %v4161_v35 = vcvt.s32.f32 %v3263_v54  ;;  %v1854_v28 = vsel %vm4068_vm13, %v3431_v5, %v3523_v39  ;;  %v4162_v48 = vcvt.s32.f32 %v3239_v51 }
 0x16e   :  { %v1718_v14 = vsel %vm1590_vm5, %v4157_v34, 3e+38  ;;  %v1719_v40 = vsel %vm1591_vm6, %v4158_v18, 3e+38  ;;  %v1720_v52 = vsel %vm1592_vm10, %v4159_v43, 3e+38  ;;  %v4163_v18 = vcvt.s32.f32 %v3272_v19 }
 0x16f   :  { %v1722_v22 = vsel %vm1594_vm11, %v4160_v11, 3e+38  ;;  %v1723_v32 = vsel %vm1595_vm12, %v4161_v35, 3e+38  ;;  %v1721_v34 = vsel %vm1593_vm14, %v4162_v48, 3e+38  ;;  %v4164_v16 = vcvt.s32.f32 %v3269_v20 }
 0x170   :  { %v1724_v0 = vsel %vm1596_vm15, %v4163_v18, 3e+38  ;;  %v1782_v57 = vmin.f32 %v1718_v14, %v1722_v22  ;;  %1855 = vst [vmem:[#allocation2] sm:$0x1] %v1854_v28  ;;  %vm1599_vm5 = vcmp.eq.f32.partialorder %v3080_v53, %v3431_v5  ;;  %v1783_v35 = vmin.f32 %v1719_v40, %v1723_v32  ;;  %v4168_v14 = vld [vmem:[#allocation41_spill] sm:$0xff]  ;;  %v4169_v40 = vld [vmem:[#allocation51_spill] sm:$0xff] }
 0x171   :  { %v1725_v43 = vsel %vm1597_vm0, %v4164_v16, 3e+38  ;;  %vm1600_vm6 = vcmp.eq.f32.partialorder %v3119_v24, %v3431_v5  ;;  %vm1601_vm10 = vcmp.eq.f32.partialorder %v3108_v33, %v3431_v5  ;;  %v1784_v20 = vmin.f32 %v1720_v52, %v1724_v0  ;;  %v4173_v18 = vld [vmem:[#allocation57_spill] sm:$0xff]  ;;  %v4176_v33 = vld [vmem:[#allocation42_spill] sm:$0xff] }
 0x172   :  { %vm1602_vm11 = vcmp.eq.f32.partialorder %v3122_v44, %v3431_v5  ;;  %vm1603_vm12 = vcmp.eq.f32.partialorder %v3098_v23, %v3431_v5  ;;  %v4165_v19 = vcvt.s32.f32 %v3287_v17  ;;  %v1785_v32 = vmin.f32 %v1721_v34, %v1725_v43  ;;  %v4171_v34 = vld [vmem:[#allocation39_spill] sm:$0xff]  ;;  %v4180_v44 = vld [vmem:[#allocation10_spill] sm:$0xff]  ;;  %v4184_v23 = vld [vmem:[#allocation13_spill] sm:$0xff] }
 0x173   :  { %vm1604_vm14 = vcmp.eq.f32.partialorder %v3176_v3, %v3431_v5  ;;  %vm1605_vm15 = vcmp.eq.f32.partialorder %v3126_v55, %v3431_v5  ;;  %v4166_v24 = vcvt.s32.f32 %v3281_v62  ;;  %vm1606_vm0 = vcmp.eq.f32.partialorder %v3134_v63, %v3431_v5  ;;  %v4188_v3 = vld [vmem:[#allocation19_spill] sm:$0xff]  ;;  %v4192_v55 = vld [vmem:[#allocation20_spill] sm:$0xff]  ;;  %v4196_v63 = vld [vmem:[#allocation22_spill] sm:$0xff] }
 0x174   :  { %v1726_v53 = vsel %vm1598_vm1, %v4165_v19, 3e+38  ;;  %vm1607_vm13 = vcmp.eq.f32.partialorder %v3111_v59, %v3431_v5  ;;  %v4167_v29 = vcvt.s32.f32 %v3304_v10  ;;  %vm1608_vm1 = vcmp.eq.f32.partialorder %v3190_v31, %v3431_v5  ;;  %v4172_v10 = vld [vmem:[#allocation14_spill] sm:$0xff]  ;;  %v4199_v59 = vld [vmem:[#allocation24_spill] sm:$0xff] }
 0x175   :  { %v1727_v0 = vsel %vm1599_vm5, %v4166_v24, 3e+38  ;;  %v1786_v22 = vmin.f32 %v1782_v57, %v1726_v53  ;;  %vm1609_vm9 = vcmp.eq.f32.partialorder %v4168_v14, %v3431_v5  ;;  %v4170_v62 = vcvt.s32.f32 %v4169_v40  ;;  %v4203_v31 = vld [vmem:[#allocation26_spill] sm:$0xff]  ;;  %v4206_v14 = vld [vmem:[#allocation28_spill] sm:$0xff] }
 0x176   :  { %v1728_v17 = vsel %vm1600_vm6, %v4167_v29, 3e+38  ;;  %v1787_v52 = vmin.f32 %v1783_v35, %v1727_v0  ;;  %vm1610_vm5 = vcmp.eq.f32.partialorder %v4171_v34, %v3431_v5  ;;  %vm1612_vm6 = vcmp.eq.f32.partialorder %v4172_v10, %v3431_v5  ;;  %v4175_v35 = vld [vmem:[#allocation12_spill] sm:$0xff]  ;;  %v4179_v0 = vld [vmem:[#allocation17_spill] sm:$0xff]  ;;  %v4209_v34 = vld [vmem:[#allocation30_spill] sm:$0xff] }
 0x177   :  { %v1729_v28 = vsel %vm1601_vm10, %v4170_v62, 3e+38  ;;  %v1788_v48 = vmin.f32 %v1784_v20, %v1728_v17  ;;  %v4174_v16 = vcvt.s32.f32 %v4173_v18  ;;  %vm1613_vm8 = vcmp.eq.f32.partialorder %v4175_v35, %v3431_v5  ;;  %v4177_v20 = vld [vmem:[#allocation55_spill] sm:$0xff]  ;;  %v4216_v11 = vld [vmem:[#allocation78_spill] sm:$0xff] }
 0x178   :  { %v1789_v57 = vmin.f32 %v1785_v32, %v1729_v28  ;;  %vm1614_vm10 = vcmp.eq.f32.partialorder %v4176_v33, %v3431_v5  ;;  %v4178_v19 = vcvt.s32.f32 %v4177_v20  ;;  %vm1616_vm7 = vcmp.eq.f32.partialorder %v4179_v0, %v3431_v5  ;;  %v4181_v32 = vld [vmem:[#allocation61_spill] sm:$0xff]  ;;  %v4183_v62 = vld [vmem:[#allocation15_spill] sm:$0xff]  ;;  %v4222_v35 = vld [vmem:[#allocation34_spill] sm:$0xff] }
 0x179   :  { %v1730_v43 = vsel %vm1602_vm11, %v4174_v16, 3e+38  ;;  %v4182_v29 = vcvt.s32.f32 %v4181_v32  ;;  %vm1618_vm4 = vcmp.eq.f32.partialorder %v4183_v62, %v3431_v5  ;;  %v4191_v32 = vld [vmem:[#allocation18_spill] sm:$0xff]  ;;  %v4217_v54 = vcvt.s32.f32 %v4216_v11  ;;  %v4223_v11 = vld [vmem:[#allocation35_spill] sm:$0xff] }
 0x17a   :  { %v1731_v53 = vsel %vm1603_vm12, %v4178_v19, 3e+38  ;;  %v1790_v24 = vmin.f32 %v1786_v22, %v1730_v43  ;;  %v4185_v22 = vld [vmem:[#allocation59_spill] sm:$0xff]  ;;  %vm1623_vm12 = vcmp.eq.f32.partialorder %v4191_v32, %v3431_v5  ;;  %v4219_v45 = vcvt.s32.f32 %v4218_v2 }
 0x17b   :  { %v1732_v17 = vsel %vm1604_vm14, %v4182_v29, 3e+38  ;;  %v1791_v40 = vmin.f32 %v1787_v52, %v1731_v53  ;;  %v4186_v28 = vcvt.s32.f32 %v4185_v22  ;;  %v4187_v43 = vld [vmem:[#allocation11_spill] sm:$0xff]  ;;  %v4189_v52 = vld [vmem:[#allocation65_spill] sm:$0xff]  ;;  %v4229_v0 = vcvt.s32.f32 %v3459_v36 }
 0x17c   :  { %v1792_v16 = vmin.f32 %v1788_v48, %v1732_v17  ;;  %vm1621_vm11 = vcmp.eq.f32.partialorder %v4187_v43, %v3431_v5  ;;  %v4190_v20 = vcvt.s32.f32 %v4189_v52  ;;  %v4193_v48 = vld [vmem:[#allocation63_spill] sm:$0xff] }
 0x17d   :  { %v1733_v18 = vsel %vm1605_vm15, %v4186_v28, 3e+38  ;;  %v4194_v29 = vcvt.s32.f32 %v4193_v48  ;;  %v4195_v28 = vld [vmem:[#allocation21_spill] sm:$0xff] }
 0x17e   :  { %v1734_v19 = vsel %vm1606_vm0, %v4190_v20, 3e+38  ;;  %v1793_v53 = vmin.f32 %v1789_v57, %v1733_v18  ;;  %vm1625_vm14 = vcmp.eq.f32.partialorder %v4195_v28, %v3431_v5  ;;  %v4197_v57 = vcvt.s32.f32 %v3382_v46  ;;  %v4198_v20 = vld [vmem:[#allocation23_spill] sm:$0xff]  ;;  %v4202_v46 = vld [vmem:[#allocation25_spill] sm:$0xff] }
 0x17f   :  { %v1735_v17 = vsel %vm1607_vm13, %v4194_v29, 3e+38  ;;  %v1794_v22 = vmin.f32 %v1790_v24, %v1734_v19  ;;  %vm1627_vm15 = vcmp.eq.f32.partialorder %v4198_v20, %v3431_v5  ;;  %v4200_v24 = vld [vmem:[#allocation67_spill] sm:$0xff] }
 0x180   :  { %v1736_v18 = vsel %vm1608_vm1, %v4197_v57, 3e+38  ;;  %v1795_v52 = vmin.f32 %v1791_v40, %v1735_v17  ;;  %v4201_v19 = vcvt.s32.f32 %v4200_v24  ;;  %v4204_v40 = vcvt.s32.f32 %v3394_v60  ;;  %v4205_v24 = vld [vmem:[#allocation27_spill] sm:$0xff] }
 0x181   :  { %v1796_v29 = vmin.f32 %v1792_v16, %v1736_v18  ;;  %vm1631_vm13 = vcmp.eq.f32.partialorder %v4205_v24, %v3431_v5  ;;  %v4207_v16 = vcvt.s32.f32 %v3388_v15 }
 0x182   :  { %v1737_v48 = vsel %vm1609_vm9, %v4201_v19, 3e+38  ;;  %v1738_v17 = vsel %vm1610_vm5, %v4204_v40, 3e+38  ;;  %vm1632_vm9 = vcmp.eq.f32.partialorder %v4206_v14, %v3431_v5  ;;  %v4208_v19 = vld [vmem:[#allocation29_spill] sm:$0xff]  ;;  %vm1634_vm5 = vcmp.eq.f32.partialorder %v4209_v34, %v3431_v5 }
 0x183   :  { %v1797_v57 = vmin.f32 %v1793_v53, %v1737_v48  ;;  %v1739_v18 = vsel %vm1611_vm2, %v4207_v16, 3e+38  ;;  %v1798_v60 = vmin.f32 %v1794_v22, %v1738_v17  ;;  %vm1633_vm1 = vcmp.eq.f32.partialorder %v4208_v19, %v3431_v5  ;;  %v4210_v53 = vld [vmem:[#allocation31_spill] sm:$0xff]  ;;  %v4211_v48 = vld [vmem:[#allocation74_spill] sm:$0xff]  ;;  %v4214_v22 = vld [vmem:[#allocation72_spill] sm:$0xff] }
 0x184   :  { %vm1635_vm0 = vcmp.eq.f32.partialorder %v4210_v53, %v3431_v5  ;;  %v4212_v40 = vcvt.s32.f32 %v4211_v48  ;;  %v1799_v51 = vmin.f32 %v1795_v52, %v1739_v18  ;;  %v4215_v17 = vcvt.s32.f32 %v4214_v22  ;;  %v4225_v22 = vld [vmem:[#allocation36_spill] sm:$0xff] }
 0x185   :  { %v1742_v48 = vsel %vm1614_vm10, %v4217_v54, 3e+38  ;;  %v1743_v52 = vsel %vm1615_vm3, %v4219_v45, 3e+38  ;;  %v4224_v54 = vcvt.s32.f32 %v3447_v26  ;;  %vm4228_vm10 = vcmp.eq.f32.partialorder %v4180_v44, %v3431_v5  ;;  %v4234_v44 = vld [vmem:[#allocation40_spill] sm:$0xff] }
 0x186   :  { %v1740_v15 = vsel %vm1612_vm6, %v4212_v40, 3e+38  ;;  %v1741_v16 = vsel %vm1613_vm8, %v4215_v17, 3e+38  ;;  %v4221_v40 = vld [vmem:[#allocation33_spill] sm:$0xff]  ;;  %vm1638_vm8 = vcmp.eq.f32.partialorder %v4222_v35, %v3431_v5  ;;  %v1802_v45 = vmin.f32 %v1798_v60, %v1742_v48  ;;  %v4226_v17 = vld [vmem:[#allocation80_spill] sm:$0xff] }
 0x187   :  { %v1800_v18 = vmin.f32 %v1796_v29, %v1740_v15  ;;  %vm1637_vm6 = vcmp.eq.f32.partialorder %v4221_v40, %v3431_v5  ;;  %v1744_v2 = vsel %vm1616_vm7, %v4224_v54, 3e+38  ;;  %v1801_v33 = vmin.f32 %v1797_v57, %v1741_v16  ;;  %v1862_v15 = vld [vmem:[#allocation2] sm:$0x1]  ;;  %v4231_v60 = vld [vmem:[#allocation43_spill] sm:$0xff] }
 0x188   :  { %v1803_v29 = vmin.f32 %v1799_v51, %v1743_v52  ;;  %v4227_v10 = vcvt.s32.f32 %v4226_v17  ;;  %v1746_v57 = vsel %vm1618_vm4, %v4229_v0, 3e+38  ;;  %v4230_v51 = vcvt.s32.f32 %v3453_v56  ;;  %1863 = vst [vmem:[#allocation4] sm:$0x1] %v1862_v15  ;;  %v4233_v52 = vld [vmem:[#allocation37_spill] sm:$0xff] }
 0x189   :  { %vm4232_vm7 = vcmp.eq.f32.partialorder %v4231_v60, %v3431_v5  ;;  %v1804_v48 = vmin.f32 %v1800_v18, %v1744_v2  ;;  %vm1641_vm3 = vcmp.eq.f32.partialorder %v4233_v52, %v3431_v5  ;;  %vm4235_vm2 = vcmp.eq.f32.partialorder %v4184_v23, %v3431_v5 }
 0x18a   :  { %v1745_v26 = vsel %vm4228_vm10, %v4227_v10, 3e+38  ;;  %v1747_v16 = vsel %vm4232_vm7, %v4230_v51, 3e+38  ;;  %vm1642_vm10 = vcmp.eq.f32.partialorder %v4234_v44, %v3431_v5  ;;  %v1748_v36 = vsel %vm4235_vm2, %v1684_v4, 3e+38 }
 0x18b   :  { %v1805_v62 = vmin.f32 %v1801_v33, %v1745_v26  ;;  %v1806_v56 = vmin.f32 %v1802_v45, %v1746_v57  ;;  %v1807_v54 = vmin.f32 %v1803_v29, %v1747_v16 }
 0x18c   :  { %2238 = shalt.err (!%p2235_p4)
}
 0x18d   :  { %1875 = dma.vmem_to_hbm [thread:$0]  %s3724_s7, 16, %s3957_s2, [#allocation5]   ;;  %v1749_v4 = vsel %vm1621_vm11, %v1685_v41, 3e+38  ;;  %v4236_v21 = vld [vmem:[#allocation46_spill] sm:$0xff]  ;;  %vm4238_vm4 = vcmp.eq.f32.partialorder %v4188_v3, %v3431_v5  ;;  %v4239_v2 = vld [vmem:[#allocation48_spill] sm:$0xff]  ;;  %v1808_v29 = vmin.f32 %v1804_v48, %v1748_v36  ;;  %vm4244_vm11 = vcmp.eq.f32.partialorder %v4192_v55, %v3431_v5 }
 0x18e   :  { %v4237_v23 = vcvt.s32.f32 %v4236_v21  ;;  %v4240_v33 = vcvt.s32.f32 %v4239_v2  ;;  %v4241_v15 = vld [vmem:[#allocation16_spill] sm:$0xff]  ;;  %v4242_v6 = vld [vmem:[#allocation49_spill] sm:$0xff]  ;;  %v1809_v43 = vmin.f32 %v1805_v62, %v1749_v4  ;;  %v4248_v51 = vld [vmem:[#allocation54_spill] sm:$0xff]  ;;  %v4298_v44 = vcvt.s32.f32 %v3478_v25  ;;  %s2274_s2 = smov [#allocation6]  }
 0x18f   :  { %vm1647_vm2 = vcmp.eq.f32.partialorder %v4241_v15, %v3431_v5  ;;  %v4243_v17 = vcvt.s32.f32 %v4242_v6  ;;  %v4245_v26 = vld [vmem:[#allocation44_spill] sm:$0xff]  ;;  %v4249_v60 = vcvt.s32.f32 %v4248_v51  ;;  %v4255_v28 = vld [vmem:[#allocation50_spill] sm:$0xff]  ;;  %v4259_v2 = vld [vmem:[#allocation53_spill] sm:$0xff]  ;;  %s1882_s12 = sshll.u32 %s2274_s2, 4  ;;  %s1883_s12 = int_to_ptr.vmem [resolvable:$true] %s1882_s12 }
 0x190   :  { %v1750_v18 = vsel %vm4238_vm4, %v4237_v23, 3e+38  ;;  %v1751_v45 = vsel %vm1623_vm12, %v4240_v33, 3e+38  ;;  %vm1648_vm7 = vcmp.eq.f32.partialorder %v4245_v26, %v3431_v5  ;;  %v4246_v0 = vld [vmem:[#allocation52_spill] sm:$0xff]  ;;  %vm4250_vm12 = vcmp.eq.f32.partialorder %v4196_v63, %v3431_v5  ;;  %v4256_v4 = vld [vmem:[#allocation58_spill] sm:$0xff]  ;;  %p2252_p6 = scmp.lt.s32.totalorder %s1883_s12, %s1883_s12 }
 0x191   :  { %v1752_v41 = vsel %vm4244_vm11, %v4243_v17, 3e+38  ;;  %v1810_v10 = vmin.f32 %v1806_v56, %v1750_v18  ;;  %v1811_v3 = vmin.f32 %v1807_v54, %v1751_v45  ;;  %v4247_v57 = vcvt.s32.f32 %v4246_v0  ;;  %v4251_v55 = vld [vmem:[#allocation56_spill] sm:$0xff]  ;;  %v4253_v56 = vld [vmem:[#allocation45_spill] sm:$0xff]  ;;  %v4254_v54 = vld [vmem:[#allocation47_spill] sm:$0xff]  ;;  %s2247_s13 = scalar_lea.vmem %s1883_s12, 16 }
 0x192   :  { %v1754_v16 = vsel %vm4250_vm12, %v4249_v60, 3e+38  ;;  %v4252_v48 = vcvt.s32.f32 %v4251_v55  ;;  %v1812_v62 = vmin.f32 %v1808_v29, %v1752_v41  ;;  %vm1649_vm4 = vcmp.eq.f32.partialorder %v4253_v56, %v3431_v5  ;;  %v4260_v33 = vld [vmem:[#allocation60_spill] sm:$0xff]  ;;  %v4263_v6 = vld [vmem:[#allocation62_spill] sm:$0xff]  ;;  %v4272_v24 = vld [vmem:[#allocation69_spill] sm:$0xff]  ;;  %p2248_p5 = scmp.ne.s32.totalorder %s1883_s12, %s2247_s13  ;;  %s2251_s14 = scalar_lea.vmem %s1883_s12, 32 }
 0x193   :  { %v1753_v32 = vsel %vm1625_vm14, %v4247_v57, 3e+38  ;;  %v4257_v21 = vcvt.s32.f32 %v4256_v4  ;;  %vm4258_vm12 = vcmp.eq.f32.partialorder %v4199_v59, %v3431_v5  ;;  %v1814_v18 = vmin.f32 %v1810_v10, %v1754_v16  ;;  %v4266_v59 = vld [vmem:[#allocation64_spill] sm:$0xff]  ;;  %p2253_p7 = scmp.lt.s32.totalorder %s2251_s14, %s2247_s13 }
 0x194   :  { %v1755_v36 = vsel %vm1627_vm15, %v4252_v48, 3e+38  ;;  %v1813_v23 = vmin.f32 %v1809_v43, %v1753_v32  ;;  %vm1652_vm15 = vcmp.eq.f32.partialorder %v4259_v2, %v3431_v5  ;;  %v4261_v45 = vcvt.s32.f32 %v4260_v33 }
 0x195   :  { %v1756_v63 = vsel %vm4258_vm12, %v4257_v21, 3e+38  ;;  %v1815_v20 = vmin.f32 %v1811_v3, %v1755_v36  ;;  %vm4262_vm11 = vcmp.eq.f32.partialorder %v4202_v46, %v3431_v5  ;;  %v4264_v17 = vcvt.s32.f32 %v4263_v6  ;;  %v4268_v3 = vld [vmem:[#allocation66_spill] sm:$0xff]  ;;  %v4281_v6 = vld [vmem:[#allocation75_spill] sm:$0xff]  ;;  %p2254_p8 = por %p2253_p7, %p2252_p6 }
 0x196   :  { %v1757_v29 = vsel %vm4262_vm11, %v4261_v45, 3e+38  ;;  %vm4265_vm14 = vcmp.eq.f32.partialorder %v4203_v31, %v3431_v5  ;;  %v4267_v0 = vcvt.s32.f32 %v4266_v59  ;;  %v1816_v10 = vmin.f32 %v1812_v62, %v1756_v63  ;;  %v4270_v31 = vld [vmem:[#allocation68_spill] sm:$0xff]  ;;  %v4274_v62 = vld [vmem:[#allocation70_spill] sm:$0xff]  ;;  %v4276_v63 = vld [vmem:[#allocation71_spill] sm:$0xff] }
 0x197   :  { %v1758_v41 = vsel %vm4265_vm14, %v4264_v17, 3e+38  ;;  %vm1980_vm12 = vcmp.eq.f32.partialorder %v3431_v5, inf  ;;  %v4269_v57 = vcvt.s32.f32 %v4268_v3  ;;  %v1817_v32 = vmin.f32 %v1813_v23, %v1757_v29  ;;  %v4279_v45 = vld [vmem:[#allocation73_spill] sm:$0xff]  ;;  %p2255_p9 = pnand %p2254_p8, %p2248_p5 }
 0x198   :  { %v1759_v43 = vsel %vm1631_vm13, %v4267_v0, 3e+38  ;;  %v1818_v51 = vmin.f32 %v1814_v18, %v1758_v41  ;;  %v4271_v16 = vcvt.s32.f32 %v4270_v31  ;;  %v4273_v48 = vcvt.s32.f32 %v4272_v24  ;;  %v4283_v41 = vld [vmem:[#allocation77_spill] sm:$0xff] }
 0x199   :  { %v1760_v46 = vsel %vm1632_vm9, %v4269_v57, 3e+38  ;;  %v1819_v60 = vmin.f32 %v1815_v20, %v1759_v43  ;;  %v4275_v4 = vcvt.s32.f32 %v4274_v62  ;;  %v4277_v23 = vcvt.s32.f32 %v4276_v63  ;;  %v4286_v43 = vld [vmem:[#allocation79_spill] sm:$0xff] }
 0x19a   :  { %v1761_v55 = vsel %vm1633_vm1, %v4271_v16, 3e+38  ;;  %v1762_v36 = vsel %vm1634_vm5, %v4273_v48, 3e+38  ;;  %v1820_v21 = vmin.f32 %v1816_v10, %v1760_v46  ;;  %vm4278_vm13 = vcmp.eq.f32.partialorder %v4213_v50, %v3431_v5 }
 0x19b   :  { %v1763_v14 = vsel %vm1635_vm0, %v4275_v4, 3e+38  ;;  %v1764_v19 = vsel %vm4278_vm13, %v4277_v23, 3e+38  ;;  %v1821_v18 = vmin.f32 %v1817_v32, %v1761_v55  ;;  %v1822_v20 = vmin.f32 %v1818_v51, %v1762_v36  ;;  %v4289_v32 = vld [vmem:[#allocation81_spill] sm:$0xff] }
 0x19c   :  { %v1823_v33 = vmin.f32 %v1819_v60, %v1763_v14  ;;  %v4280_v29 = vcvt.s32.f32 %v4279_v45  ;;  %v4282_v17 = vcvt.s32.f32 %v4281_v6  ;;  %v4284_v59 = vcvt.s32.f32 %v4283_v41  ;;  %v1856_v41 = vld [vmem:[#allocation3] sm:$0x1] }
 0x19d   :  { %vm4285_vm0 = vcmp.eq.f32.partialorder %v4223_v11, %v3431_v5  ;;  %v1824_v0 = vmin.f32 %v1820_v21, %v1764_v19  ;;  %v4287_v10 = vcvt.s32.f32 %v4286_v43  ;;  %vm4288_vm1 = vcmp.eq.f32.partialorder %v4225_v22, %v3431_v5 }
 0x19e   :  { %v1765_v34 = vsel %vm1637_vm6, %v4280_v29, 3e+38  ;;  %v1766_v53 = vsel %vm1638_vm8, %v4282_v17, 3e+38  ;;  %v1767_v50 = vsel %vm4285_vm0, %v4284_v59, 3e+38  ;;  %v4290_v51 = vcvt.s32.f32 %v4289_v32 }
 0x19f   :  { %v1768_v40 = vsel %vm4288_vm1, %v4287_v10, 3e+38  ;;  %v1825_v3 = vmin.f32 %v1821_v18, %v1765_v34  ;;  %v1826_v57 = vmin.f32 %v1822_v20, %v1766_v53  ;;  %v1827_v46 = vmin.f32 %v1823_v33, %v1767_v50 }
 0x1a0   :  { %v1769_v35 = vsel %vm1641_vm3, %v4290_v51, 3e+38  ;;  %v4291_v60 = vcvt.s32.f32 %v3450_v49  ;;  %v4292_v31 = vcvt.s32.f32 %v3456_v7  ;;  %vm4293_vm9 = vcmp.eq.f32.partialorder %v3192_v30, %v3431_v5 }
 0x1a1   :  { %v1828_v16 = vmin.f32 %v1824_v0, %v1768_v40  ;;  %v4294_v55 = vcvt.s32.f32 %v3462_v27  ;;  %vm4295_vm5 = vcmp.eq.f32.partialorder %v3215_v61, %v3431_v5  ;;  %v1829_v24 = vmin.f32 %v1825_v3, %v1769_v35 }
 0x1a2   :  { %v1770_v11 = vsel %vm1642_vm10, %v4291_v60, 3e+38  ;;  %v1771_v22 = vsel %vm4293_vm9, %v4292_v31, 3e+38  ;;  %v4296_v36 = vcvt.s32.f32 %v3470_v1  ;;  %vm4297_vm6 = vcmp.eq.f32.partialorder %v3224_v9, %v3431_v5 }
 0x1a3   :  { %v1772_v52 = vsel %vm4295_vm5, %v4294_v55, 3e+38  ;;  %v1830_v48 = vmin.f32 %v1826_v57, %v1770_v11  ;;  %v1831_v49 = vmin.f32 %v1827_v46, %v1771_v22  ;;  %vm4299_vm8 = vcmp.eq.f32.partialorder %v3232_v13, %v3431_v5 }
 0x1a4   :  { %v1773_v7 = vsel %vm4297_vm6, %v4296_v36, 3e+38  ;;  %v1774_v30 = vsel %vm4299_vm8, %v4298_v44, 3e+38  ;;  %v4300_v27 = vcvt.s32.f32 %v3481_v37  ;;  %v1832_v62 = vmin.f32 %v1828_v16, %v1772_v52 }
 0x1a5   :  { %v4301_v4 = vcvt.s32.f32 %v3484_v42  ;;  %v1833_v1 = vmin.f32 %v1829_v24, %v1773_v7  ;;  %v1834_v14 = vmin.f32 %v1830_v48, %v1774_v30  ;;  %v4302_v21 = vcvt.s32.f32 %v3491_v47 }
 0x1a6   :  { %v1775_v61 = vsel %vm1647_vm2, %v4300_v27, 3e+38  ;;  %v4303_v13 = vcvt.s32.f32 %v3511_v58  ;;  %vm4304_vm3 = vcmp.eq.f32.partialorder %v4254_v54, %v3431_v5  ;;  %v4305_v42 = vcvt.s32.f32 %v3534_v12 }
 0x1a7   :  { %v1776_v9 = vsel %vm1648_vm7, %v4301_v4, 3e+38  ;;  %v1835_v25 = vmin.f32 %v1831_v49, %v1775_v61  ;;  %v1777_v37 = vsel %vm1649_vm4, %v4302_v21, 3e+38  ;;  %vm4306_vm10 = vcmp.eq.f32.partialorder %v4255_v28, %v3431_v5 }
 0x1a8   :  { %v1778_v15 = vsel %vm4304_vm3, %v4303_v13, 3e+38  ;;  %v1779_v26 = vsel %vm4306_vm10, %v4305_v42, 3e+38  ;;  %v1836_v63 = vmin.f32 %v1832_v62, %v1776_v9  ;;  %v4307_v23 = vcvt.s32.f32 %v3257_v8 }
 0x1a9   :  { %v1837_v56 = vmin.f32 %v1833_v1, %v1777_v37  ;;  %v1838_v19 = vmin.f32 %v1834_v14, %v1778_v15  ;;  %v1839_v58 = vmin.f32 %v1835_v25, %v1779_v26  ;;  %v4308_v18 = vcvt.s32.f32 %v3494_v38 }
 0x1aa   :  { %v1780_v47 = vsel %vm1652_vm15, %v4307_v23, 3e+38  ;;  %vm4309_vm2 = vcmp.lt.f32.partialorder %v3431_v5, %v3523_v39 }
 0x1ab   :  { %v1781_v54 = vsel %vm1980_vm12, %v4308_v18, 3e+38  ;;  %v1840_v12 = vmin.f32 %v1836_v63, %v1780_v47  ;;  %v1842_v33 = vmin.f32 %v1838_v19, %v1839_v58 }
 0x1ac   :  { %v1841_v20 = vmin.f32 %v1837_v56, %v1781_v54 }
 0x1ae   :  { %v1843_v28 = vmin.f32 %v1840_v12, %v1841_v20 }
 0x1b0   :  { %v1844_v45 = vmin.f32 %v1842_v33, %v1843_v28 }
 0x1b2   :  { %v1845_v29 = vrot.slane %v1844_v45, 4 }
 0x1b4   :  { %v1846_v34 = vmin.f32 %v1844_v45, %v1845_v29 }
 0x1b6   :  { %v1847_v8 = vrot.slane %v1846_v34, 2 }
 0x1b8   :  { %v1848_v6 = vmin.f32 %v1846_v34, %v1847_v8 }
 0x1ba   :  { %v1849_v17 = vrot.slane %v1848_v6, 1 }
 0x1bc   :  { %v1850_v2 = vmin.f32 %v1848_v6, %v1849_v17 }
 0x1be   :  { %v2221_v53 = vtrunc.f32 %v1850_v2 }
 0x1c0   :  { %v2222_v59 = vcvt.f32.s32 %v2221_v53 }
 0x1c2   :  { %v1857_v38 = vsel %vm4309_vm2, %v2222_v59, %v1856_v41 }
 0x1c3   :  { %1858 = vst [vmem:[#allocation3] sm:$0x1] %v1857_v38 }
 0x1ca   :  { %v1864_v50 = vld [vmem:[#allocation3] sm:$0x1] }
 0x1cb   :  { %1865 = vst [vmem:[#allocation6] sm:$0x1] %v1864_v50 }
 0x1cc   :  { %2258 = shalt.err (!%p2255_p9)
}
 0x1cd   :  { %1885 = dma.vmem_to_hbm [thread:$0]  %s1883_s12, 16, %s3958_s3, [#allocation7]  }
 0x1ce   :  { %2267 = dma.done.wait [#allocation5], 16  }
 0x1cf   :  { %2268 = vsyncadd [#allocation5], 4294967280 }
 0x1d0   :  { %2269 = dma.done.wait [#allocation7], 16  }
 0x1d1   :  { %2270 = vsyncadd [#allocation7], 4294967280 }
 0x1d2   :  { %1892 = vsyncpa [#allocation5], 1 }
 0x1d3   :  { %1893 = vsyncpa [#allocation7], 1 }

</bundles_post_ra>
